<compile_context>
chip_gen: v5e
topology: v5e:2x2
jax: 0.10.0
libtpu: 0.0.40
codegen_flags: <defaults>
</compile_context>

<pallas_src>
import functools

import jax
import jax.numpy as jnp
from jax.experimental import pallas as pl
from jax.experimental.pallas import tpu as pltpu

EPS = 1e-5
C_IN, C1, C2, C3, C_OUT = 60, 40, 20, 40, 60   # module channel sizes
P_IN, P2, P_OUT = 64, 24, 64                   # sublane-aligned (padded to x8)


# ----------------------------------------------------------------------------
# Kernel
# ----------------------------------------------------------------------------
def _sgg_kernel(x_ref, lm_ref, rm_ref, vm_ref,
                w1_ref, w2_ref, w3_ref, w4_ref, vec_ref,
                out_ref, *, inv_count, has_padding, mxu_dtype):
    lpad = x_ref.shape[1]
    left_m = lm_ref[...]      # (1, lpad): 1.0 where lane l has a same-sample l-1
    right_m = rm_ref[...]     # (1, lpad): 1.0 where lane l has a same-sample l+1
    valid = vm_ref[...]       # (1, lpad): 1.0 on real (non-padding) lanes
    vec = vec_ref[...]        # (64, 16): packed bias/gamma/beta columns

    def col(j, rows):
        return vec[0:rows, j:j + 1]

    def mm(w, a):
        return jnp.dot(w.astype(mxu_dtype), a.astype(mxu_dtype),
                       preferred_element_type=jnp.float32)

    def conv(h, w_ref, b):
        # k=3 / stride=1 / pad=1 conv over the folded (N*L) lane axis:
        # one accumulating MXU matmul per tap; sample boundaries handled by
        # the precomputed left/right masks (one VPU mul each, XLU roll is free).
        hl = pltpu.roll(h, 1, axis=1) * left_m           # x[l-1], 0 at sample starts
        hr = pltpu.roll(h, lpad - 1, axis=1) * right_m   # x[l+1], 0 at sample ends
        return mm(w_ref[0], hl) + mm(w_ref[1], h) + mm(w_ref[2], hr) + b

    def bn_relu(h, gamma, beta):
        # Training-mode BatchNorm1d over the valid (N*L) lanes, biased variance,
        # single fused stats pass: var = E[x^2] - mean^2.
        hv = h * valid if has_padding else h
        m = jnp.sum(hv, axis=1, keepdims=True) * inv_count
        ex2 = jnp.sum(h * hv, axis=1, keepdims=True) * inv_count
        scale = gamma * jax.lax.rsqrt(ex2 - m * m + EPS)     # EUP rsqrt
        shift = beta - m * scale
        return jnp.maximum(h * scale + shift, 0.0)           # single FMA-ish pass + ReLU

    x = x_ref[...]
    h1 = bn_relu(conv(x, w1_ref, col(0, C1)), col(1, C1), col(2, C1))
    h2 = bn_relu(conv(h1, w2_ref, col(3, P2)), col(4, P2), col(5, P2))
    h3 = bn_relu(conv(h2, w3_ref, col(6, C3)), col(7, C3), col(8, C3)) + h1
    out_ref[...] = conv(h3, w4_ref, col(9, P_OUT)).astype(out_ref.dtype)


# ----------------------------------------------------------------------------
# Parameter preparation (all fusion / padding done once, outside the kernel)
# ----------------------------------------------------------------------------
def _conv_taps(w, cout_pad, cin_pad):
    """Conv1d weight (Cout, Cin, 3) -> per-tap slabs (3, cout_pad, cin_pad)."""
    co, ci, _ = w.shape
    taps = [jnp.pad(w[:, :, k], ((0, cout_pad - co), (0, cin_pad - ci)))
            for k in range(3)]                       # tap k pairs with x[l-1+k]
    return jnp.stack(taps, axis=0)


def _convT_taps(w, cout_pad, cin_pad):
    """ConvTranspose1d weight (Cin, Cout, 3), stride=1/pad=1 == Conv1d with
    w_eq[o, i, k] = w[i, o, 2-k]; returned as per-tap slabs (3, cout_pad, cin_pad)."""
    ci, co, _ = w.shape
    taps = [jnp.pad(jnp.transpose(w[:, :, 2 - k]),
                    ((0, cout_pad - co), (0, cin_pad - ci)))
            for k in range(3)]
    return jnp.stack(taps, axis=0)


def init_params(key):
    """Deterministic PyTorch-layout parameters of a fresh module."""
    ks = jax.random.split(key, 8)

    def uinit(k, shape, fan_in):
        s = 1.0 / jnp.sqrt(float(fan_in))
        return jax.random.uniform(k, shape, jnp.float32, -s, s)

    return dict(
        w1=uinit(ks[0], (C1, C_IN, 3), C_IN * 3), b1=uinit(ks[1], (C1, 1), C_IN * 3),
        w2=uinit(ks[2], (C2, C1, 3), C1 * 3),     b2=uinit(ks[3], (C2, 1), C1 * 3),
        w3=uinit(ks[4], (C2, C3, 3), C2 * 3),     b3=uinit(ks[5], (C3, 1), C2 * 3),
        w4=uinit(ks[6], (C3, C_OUT, 3), C3 * 3),  b4=uinit(ks[7], (C_OUT, 1), C3 * 3),
        g1=jnp.ones((C1, 1), jnp.float32), be1=jnp.zeros((C1, 1), jnp.float32),
        g2=jnp.ones((C2, 1), jnp.float32), be2=jnp.zeros((C2, 1), jnp.float32),
        g3=jnp.ones((C3, 1), jnp.float32), be3=jnp.zeros((C3, 1), jnp.float32),
    )


def pack_params(p):
    """PyTorch-layout params -> kernel-ready per-tap / sublane-padded tensors."""
    vec_cols = [p["b1"], p["g1"], p["be1"],
                p["b2"], p["g2"], p["be2"],
                p["b3"], p["g3"], p["be3"],
                p["b4"]]
    vec = jnp.zeros((P_OUT, 16), jnp.float32)
    for j, v in enumerate(vec_cols):
        vec = vec.at[:v.shape[0], j].set(v[:, 0])
    return dict(
        w1=_conv_taps(p["w1"], C1, P_IN),        # (3, 40, 64)
        w2=_conv_taps(p["w2"], P2, C1),          # (3, 24, 40)
        w3=_convT_taps(p["w3"], C3, P2),         # (3, 40, 24)
        w4=_convT_taps(p["w4"], P_OUT, C3),      # (3, 64, 40), rows 60..63 zero
        vec=vec,   # columns: b1,g1,be1,b2,g2,be2,b3,g3,be3,b4 (zero-padded rows)
    )


# ----------------------------------------------------------------------------
# Wrapper
# ----------------------------------------------------------------------------
def _round_up(x, m):
    return (x + m - 1) // m * m


@functools.partial(jax.jit, static_argnames=("mxu_dtype",))
def synthetic_gradient_generator(x, kernel_params, mxu_dtype=jnp.float32):
    """x: (N, 60, L) -> (N, 60, L); matches the PyTorch module in train mode."""
    N, C, L = x.shape
    assert C == C_IN
    nl = N * L
    lpad = _round_up(max(nl, 128), 128)          # lane-dense slab width
    has_padding = lpad != nl                     # trace-time specialization flag

    # (N, C, L) -> (C, N*L); pad channels to 64 sublanes and lanes to lpad.
    x2 = jnp.transpose(x, (1, 0, 2)).reshape(C, nl).astype(jnp.float32)
    x2 = jnp.pad(x2, ((0, P_IN - C), (0, lpad - nl)))

    lane = jnp.arange(lpad)
    in_sample = lane < nl
    left_m = (((lane % L) != 0) & in_sample).astype(jnp.float32)[None, :]
    right_m = (((lane % L) != (L - 1)) & in_sample).astype(jnp.float32)[None, :]
    valid_m = in_sample.astype(jnp.float32)[None, :]

    kp = kernel_params
    ins = (x2, left_m, right_m, valid_m,
           kp["w1"], kp["w2"], kp["w3"], kp["w4"], kp["vec"])

    # Scoped-VMEM budget from the actual slab footprint (live activations plus
    # per-conv temporaries), with 2x headroom; capped below v7x physical VMEM.
    rows_live = P_IN + C1 + P2 + C3 + P_OUT + 3 * P_IN
    vmem_limit = int(min(60 * 2**20, max(8 * 2**20, 2 * 4 * lpad * rows_live)))

    out2 = pl.pallas_call(
        functools.partial(_sgg_kernel, inv_count=1.0 / float(nl),
                          has_padding=has_padding, mxu_dtype=mxu_dtype),
        out_shape=jax.ShapeDtypeStruct((P_OUT, lpad), jnp.float32),
        in_specs=[pl.BlockSpec(memory_space=pltpu.MemorySpace.VMEM)] * len(ins),
        out_specs=pl.BlockSpec(memory_space=pltpu.MemorySpace.VMEM),
        compiler_params=pltpu.CompilerParams(vmem_limit_bytes=vmem_limit),
    )(*ins)

    out = out2[:C_OUT, :nl].reshape(C_OUT, N, L).transpose(1, 0, 2)
    return out.astype(x.dtype)


# ----------------------------------------------------------------------------
# Pure-JAX reference (for correctness demonstration)
# ----------------------------------------------------------------------------
def _ref_forward(x, p):
    def conv1d(h, w, b):
        y = jax.lax.conv_general_dilated(
            h, w, window_strides=(1,), padding=[(1, 1)],
            dimension_numbers=("NCH", "OIH", "NCH"),
            precision=jax.lax.Precision.HIGHEST)
        return y + b[None, :, :]

    def convT1d(h, w, b):
        w_eq = jnp.transpose(w[:, :, ::-1], (1, 0, 2))   # (Cout, Cin, 3)
        return conv1d(h, w_eq, b)

    def bn_relu(h, gamma, beta):
        m = jnp.mean(h, axis=(0, 2), keepdims=True)
        v = jnp.mean((h - m) ** 2, axis=(0, 2), keepdims=True)
        y = (h - m) * jax.lax.rsqrt(v + EPS)
        y = y * gamma[None, :, :] + beta[None, :, :]
        return jnp.maximum(y, 0.0)

    h1 = bn_relu(conv1d(x, p["w1"], p["b1"]), p["g1"], p["be1"])
    h2 = bn_relu(conv1d(h1, p["w2"], p["b2"]), p["g2"], p["be2"])
    h3 = bn_relu(convT1d(h2, p["w3"], p["b3"]), p["g3"], p["be3"]) + h1
    return convT1d(h3, p["w4"], p["b4"])


if __name__ == "__main__":
    key = jax.random.PRNGKey(0)
    kx1, kx2, kparam = jax.random.split(key, 3)

    pt_params = init_params(kparam)            # PyTorch-layout parameters
    kernel_params = pack_params(pt_params)     # per-tap / padded for the kernel

    # 1) Padded-lane path: N*L = 32 < 128 (exercises the valid-mask code).
    x_a = jax.random.normal(kx1, (2, C_IN, 16), jnp.float32)
    out_a = synthetic_gradient_generator(x_a, kernel_params)
    jax.block_until_ready(out_a)
    assert out_a.shape == (2, C_OUT, 16) and out_a.dtype == jnp.float32
    err_a = float(jnp.max(jnp.abs(out_a - _ref_forward(x_a, pt_params))))
    assert err_a < 2e-3, f"padded path mismatch: max abs err = {err_a}"

    # 2) Lane-exact fast path: N*L = 128 (valid-mask work compiled out).
    x_b = jax.random.normal(kx2, (2, C_IN, 64), jnp.float32)
    out_b = synthetic_gradient_generator(x_b, kernel_params)
    jax.block_until_ready(out_b)
    err_b = float(jnp.max(jnp.abs(out_b - _ref_forward(x_b, pt_params))))
    assert err_b < 2e-3, f"exact path mismatch: max abs err = {err_b}"

    # 3) bf16 MXU operands (v6e / v7x fast path), f32 accumulation.
    out_c = synthetic_gradient_generator(x_a, kernel_params,
                                         mxu_dtype=jnp.bfloat16)
    jax.block_until_ready(out_c)
    err_c = float(jnp.max(jnp.abs(out_c - _ref_forward(x_a, pt_params))))
    assert err_c < 1.5e-1, f"bf16 path mismatch: max abs err = {err_c}"

    print("KERNEL_OK")
</pallas_src>

<mosaic_0001>
module attributes {stable_mosaic.version = 11 : i64} {
  func.func @_sgg_kernel(%arg0: memref<64x128xf32, #tpu.memory_space<vmem>>, %arg1: memref<1x128xf32, #tpu.memory_space<vmem>>, %arg2: memref<1x128xf32, #tpu.memory_space<vmem>>, %arg3: memref<1x128xf32, #tpu.memory_space<vmem>>, %arg4: memref<3x40x64xf32, #tpu.memory_space<vmem>>, %arg5: memref<3x24x40xf32, #tpu.memory_space<vmem>>, %arg6: memref<3x40x24xf32, #tpu.memory_space<vmem>>, %arg7: memref<3x64x40xf32, #tpu.memory_space<vmem>>, %arg8: memref<64x16xf32, #tpu.memory_space<vmem>>, %arg9: memref<64x128xf32, #tpu.memory_space<vmem>>) attributes {dimension_semantics = [], scalar_prefetch = 0 : i64, scratch_operands = 0 : i64, tpu.core_type = #tpu.core_type<tc>} {
    %c0 = arith.constant 0 : index
    %c0_0 = arith.constant 0 : index
    %0 = vector.load %arg1[%c0, %c0_0] : memref<1x128xf32, #tpu.memory_space<vmem>>, vector<1x128xf32>
    %c0_1 = arith.constant 0 : index
    %c0_2 = arith.constant 0 : index
    %1 = vector.load %arg2[%c0_1, %c0_2] : memref<1x128xf32, #tpu.memory_space<vmem>>, vector<1x128xf32>
    %c0_3 = arith.constant 0 : index
    %c0_4 = arith.constant 0 : index
    %2 = vector.load %arg3[%c0_3, %c0_4] : memref<1x128xf32, #tpu.memory_space<vmem>>, vector<1x128xf32>
    %c0_5 = arith.constant 0 : index
    %c0_6 = arith.constant 0 : index
    %3 = vector.load %arg8[%c0_5, %c0_6] : memref<64x16xf32, #tpu.memory_space<vmem>>, vector<64x16xf32>
    %c0_7 = arith.constant 0 : index
    %c0_8 = arith.constant 0 : index
    %4 = vector.load %arg0[%c0_7, %c0_8] : memref<64x128xf32, #tpu.memory_space<vmem>>, vector<64x128xf32>
    %5 = vector.extract_strided_slice %3 {offsets = [0, 0], sizes = [40, 1], strides = [1, 1]} : vector<64x16xf32> to vector<40x1xf32>
    %c1_i32 = arith.constant 1 : i32
    %6 = tpu.dynamic_rotate %4 by %c1_i32 dim 1 : vector<64x128xf32>, i32 -> vector<64x128xf32>
    %7 = vector.broadcast %0 : vector<1x128xf32> to vector<64x128xf32>
    %8 = arith.mulf %6, %7 : vector<64x128xf32>
    %c127_i32 = arith.constant 127 : i32
    %9 = tpu.dynamic_rotate %4 by %c127_i32 dim 1 : vector<64x128xf32>, i32 -> vector<64x128xf32>
    %10 = vector.broadcast %1 : vector<1x128xf32> to vector<64x128xf32>
    %11 = arith.mulf %9, %10 : vector<64x128xf32>
    %c0_9 = arith.constant 0 : index
    %c0_10 = arith.constant 0 : index
    %c0_11 = arith.constant 0 : index
    %12 = vector.load %arg4[%c0_9, %c0_10, %c0_11] : memref<3x40x64xf32, #tpu.memory_space<vmem>>, vector<1x40x64xf32>
    %13 = vector.shape_cast %12 : vector<1x40x64xf32> to vector<40x64xf32>
    %cst = arith.constant dense<0.000000e+00> : vector<40x128xf32>
    %14 = tpu.matmul %13, %8, %cst {dimension_numbers = #tpu.dot_dimension_numbers<[1], [0], [0], [1], [0, 0, 1, 1], [], []>} : vector<40x64xf32>, vector<64x128xf32>, vector<40x128xf32> -> vector<40x128xf32>
    %c1 = arith.constant 1 : index
    %c0_12 = arith.constant 0 : index
    %c0_13 = arith.constant 0 : index
    %15 = vector.load %arg4[%c1, %c0_12, %c0_13] : memref<3x40x64xf32, #tpu.memory_space<vmem>>, vector<1x40x64xf32>
    %16 = vector.shape_cast %15 : vector<1x40x64xf32> to vector<40x64xf32>
    %cst_14 = arith.constant dense<0.000000e+00> : vector<40x128xf32>
    %17 = tpu.matmul %16, %4, %cst_14 {dimension_numbers = #tpu.dot_dimension_numbers<[1], [0], [0], [1], [0, 0, 1, 1], [], []>} : vector<40x64xf32>, vector<64x128xf32>, vector<40x128xf32> -> vector<40x128xf32>
    %18 = arith.addf %14, %17 : vector<40x128xf32>
    %c2 = arith.constant 2 : index
    %c0_15 = arith.constant 0 : index
    %c0_16 = arith.constant 0 : index
    %19 = vector.load %arg4[%c2, %c0_15, %c0_16] : memref<3x40x64xf32, #tpu.memory_space<vmem>>, vector<1x40x64xf32>
    %20 = vector.shape_cast %19 : vector<1x40x64xf32> to vector<40x64xf32>
    %cst_17 = arith.constant dense<0.000000e+00> : vector<40x128xf32>
    %21 = tpu.matmul %20, %11, %cst_17 {dimension_numbers = #tpu.dot_dimension_numbers<[1], [0], [0], [1], [0, 0, 1, 1], [], []>} : vector<40x64xf32>, vector<64x128xf32>, vector<40x128xf32> -> vector<40x128xf32>
    %22 = arith.addf %18, %21 : vector<40x128xf32>
    %23 = vector.broadcast %5 : vector<40x1xf32> to vector<40x128xf32>
    %24 = arith.addf %22, %23 : vector<40x128xf32>
    %25 = vector.extract_strided_slice %3 {offsets = [0, 1], sizes = [40, 1], strides = [1, 1]} : vector<64x16xf32> to vector<40x1xf32>
    %26 = vector.extract_strided_slice %3 {offsets = [0, 2], sizes = [40, 1], strides = [1, 1]} : vector<64x16xf32> to vector<40x1xf32>
    %27 = vector.broadcast %2 : vector<1x128xf32> to vector<40x128xf32>
    %28 = arith.mulf %24, %27 : vector<40x128xf32>
    %cst_18 = arith.constant dense<0.000000e+00> : vector<40xf32>
    %29 = vector.multi_reduction <add>, %28, %cst_18 [1] : vector<40x128xf32> to vector<40xf32>
    %30 = vector.shape_cast %29 : vector<40xf32> to vector<40x1xf32>
    %cst_19 = arith.constant 3.125000e-02 : f32
    %31 = vector.broadcast %cst_19 : f32 to vector<40x1xf32>
    %32 = arith.mulf %30, %31 : vector<40x1xf32>
    %33 = arith.mulf %24, %28 : vector<40x128xf32>
    %cst_20 = arith.constant dense<0.000000e+00> : vector<40xf32>
    %34 = vector.multi_reduction <add>, %33, %cst_20 [1] : vector<40x128xf32> to vector<40xf32>
    %35 = vector.shape_cast %34 : vector<40xf32> to vector<40x1xf32>
    %cst_21 = arith.constant 3.125000e-02 : f32
    %36 = vector.broadcast %cst_21 : f32 to vector<40x1xf32>
    %37 = arith.mulf %35, %36 : vector<40x1xf32>
    %38 = arith.mulf %32, %32 : vector<40x1xf32>
    %39 = arith.subf %37, %38 : vector<40x1xf32>
    %cst_22 = arith.constant 9.99999974E-6 : f32
    %40 = vector.broadcast %cst_22 : f32 to vector<40x1xf32>
    %41 = arith.addf %39, %40 : vector<40x1xf32>
    %42 = math.rsqrt %41 : vector<40x1xf32>
    %43 = arith.mulf %25, %42 : vector<40x1xf32>
    %44 = arith.mulf %32, %43 : vector<40x1xf32>
    %45 = arith.subf %26, %44 : vector<40x1xf32>
    %46 = vector.broadcast %43 : vector<40x1xf32> to vector<40x128xf32>
    %47 = arith.mulf %24, %46 : vector<40x128xf32>
    %48 = vector.broadcast %45 : vector<40x1xf32> to vector<40x128xf32>
    %49 = arith.addf %47, %48 : vector<40x128xf32>
    %cst_23 = arith.constant 0.000000e+00 : f32
    %50 = vector.broadcast %cst_23 : f32 to vector<40x128xf32>
    %51 = arith.maximumf %49, %50 : vector<40x128xf32>
    %52 = vector.extract_strided_slice %3 {offsets = [0, 3], sizes = [24, 1], strides = [1, 1]} : vector<64x16xf32> to vector<24x1xf32>
    %c1_i32_24 = arith.constant 1 : i32
    %53 = tpu.dynamic_rotate %51 by %c1_i32_24 dim 1 : vector<40x128xf32>, i32 -> vector<40x128xf32>
    %54 = vector.broadcast %0 : vector<1x128xf32> to vector<40x128xf32>
    %55 = arith.mulf %53, %54 : vector<40x128xf32>
    %c127_i32_25 = arith.constant 127 : i32
    %56 = tpu.dynamic_rotate %51 by %c127_i32_25 dim 1 : vector<40x128xf32>, i32 -> vector<40x128xf32>
    %57 = vector.broadcast %1 : vector<1x128xf32> to vector<40x128xf32>
    %58 = arith.mulf %56, %57 : vector<40x128xf32>
    %c0_26 = arith.constant 0 : index
    %c0_27 = arith.constant 0 : index
    %c0_28 = arith.constant 0 : index
    %59 = vector.load %arg5[%c0_26, %c0_27, %c0_28] : memref<3x24x40xf32, #tpu.memory_space<vmem>>, vector<1x24x40xf32>
    %60 = vector.shape_cast %59 : vector<1x24x40xf32> to vector<24x40xf32>
    %cst_29 = arith.constant dense<0.000000e+00> : vector<24x128xf32>
    %61 = tpu.matmul %60, %55, %cst_29 {dimension_numbers = #tpu.dot_dimension_numbers<[1], [0], [0], [1], [0, 0, 1, 1], [], []>} : vector<24x40xf32>, vector<40x128xf32>, vector<24x128xf32> -> vector<24x128xf32>
    %c1_30 = arith.constant 1 : index
    %c0_31 = arith.constant 0 : index
    %c0_32 = arith.constant 0 : index
    %62 = vector.load %arg5[%c1_30, %c0_31, %c0_32] : memref<3x24x40xf32, #tpu.memory_space<vmem>>, vector<1x24x40xf32>
    %63 = vector.shape_cast %62 : vector<1x24x40xf32> to vector<24x40xf32>
    %cst_33 = arith.constant dense<0.000000e+00> : vector<24x128xf32>
    %64 = tpu.matmul %63, %51, %cst_33 {dimension_numbers = #tpu.dot_dimension_numbers<[1], [0], [0], [1], [0, 0, 1, 1], [], []>} : vector<24x40xf32>, vector<40x128xf32>, vector<24x128xf32> -> vector<24x128xf32>
    %65 = arith.addf %61, %64 : vector<24x128xf32>
    %c2_34 = arith.constant 2 : index
    %c0_35 = arith.constant 0 : index
    %c0_36 = arith.constant 0 : index
    %66 = vector.load %arg5[%c2_34, %c0_35, %c0_36] : memref<3x24x40xf32, #tpu.memory_space<vmem>>, vector<1x24x40xf32>
    %67 = vector.shape_cast %66 : vector<1x24x40xf32> to vector<24x40xf32>
    %cst_37 = arith.constant dense<0.000000e+00> : vector<24x128xf32>
    %68 = tpu.matmul %67, %58, %cst_37 {dimension_numbers = #tpu.dot_dimension_numbers<[1], [0], [0], [1], [0, 0, 1, 1], [], []>} : vector<24x40xf32>, vector<40x128xf32>, vector<24x128xf32> -> vector<24x128xf32>
    %69 = arith.addf %65, %68 : vector<24x128xf32>
    %70 = vector.broadcast %52 : vector<24x1xf32> to vector<24x128xf32>
    %71 = arith.addf %69, %70 : vector<24x128xf32>
    %72 = vector.extract_strided_slice %3 {offsets = [0, 4], sizes = [24, 1], strides = [1, 1]} : vector<64x16xf32> to vector<24x1xf32>
    %73 = vector.extract_strided_slice %3 {offsets = [0, 5], sizes = [24, 1], strides = [1, 1]} : vector<64x16xf32> to vector<24x1xf32>
    %74 = vector.broadcast %2 : vector<1x128xf32> to vector<24x128xf32>
    %75 = arith.mulf %71, %74 : vector<24x128xf32>
    %cst_38 = arith.constant dense<0.000000e+00> : vector<24xf32>
    %76 = vector.multi_reduction <add>, %75, %cst_38 [1] : vector<24x128xf32> to vector<24xf32>
    %77 = vector.shape_cast %76 : vector<24xf32> to vector<24x1xf32>
    %cst_39 = arith.constant 3.125000e-02 : f32
    %78 = vector.broadcast %cst_39 : f32 to vector<24x1xf32>
    %79 = arith.mulf %77, %78 : vector<24x1xf32>
    %80 = arith.mulf %71, %75 : vector<24x128xf32>
    %cst_40 = arith.constant dense<0.000000e+00> : vector<24xf32>
    %81 = vector.multi_reduction <add>, %80, %cst_40 [1] : vector<24x128xf32> to vector<24xf32>
    %82 = vector.shape_cast %81 : vector<24xf32> to vector<24x1xf32>
    %cst_41 = arith.constant 3.125000e-02 : f32
    %83 = vector.broadcast %cst_41 : f32 to vector<24x1xf32>
    %84 = arith.mulf %82, %83 : vector<24x1xf32>
    %85 = arith.mulf %79, %79 : vector<24x1xf32>
    %86 = arith.subf %84, %85 : vector<24x1xf32>
    %cst_42 = arith.constant 9.99999974E-6 : f32
    %87 = vector.broadcast %cst_42 : f32 to vector<24x1xf32>
    %88 = arith.addf %86, %87 : vector<24x1xf32>
    %89 = math.rsqrt %88 : vector<24x1xf32>
    %90 = arith.mulf %72, %89 : vector<24x1xf32>
    %91 = arith.mulf %79, %90 : vector<24x1xf32>
    %92 = arith.subf %73, %91 : vector<24x1xf32>
    %93 = vector.broadcast %90 : vector<24x1xf32> to vector<24x128xf32>
    %94 = arith.mulf %71, %93 : vector<24x128xf32>
    %95 = vector.broadcast %92 : vector<24x1xf32> to vector<24x128xf32>
    %96 = arith.addf %94, %95 : vector<24x128xf32>
    %cst_43 = arith.constant 0.000000e+00 : f32
    %97 = vector.broadcast %cst_43 : f32 to vector<24x128xf32>
    %98 = arith.maximumf %96, %97 : vector<24x128xf32>
    %99 = vector.extract_strided_slice %3 {offsets = [0, 6], sizes = [40, 1], strides = [1, 1]} : vector<64x16xf32> to vector<40x1xf32>
    %c1_i32_44 = arith.constant 1 : i32
    %100 = tpu.dynamic_rotate %98 by %c1_i32_44 dim 1 : vector<24x128xf32>, i32 -> vector<24x128xf32>
    %101 = vector.broadcast %0 : vector<1x128xf32> to vector<24x128xf32>
    %102 = arith.mulf %100, %101 : vector<24x128xf32>
    %c127_i32_45 = arith.constant 127 : i32
    %103 = tpu.dynamic_rotate %98 by %c127_i32_45 dim 1 : vector<24x128xf32>, i32 -> vector<24x128xf32>
    %104 = vector.broadcast %1 : vector<1x128xf32> to vector<24x128xf32>
    %105 = arith.mulf %103, %104 : vector<24x128xf32>
    %c0_46 = arith.constant 0 : index
    %c0_47 = arith.constant 0 : index
    %c0_48 = arith.constant 0 : index
    %106 = vector.load %arg6[%c0_46, %c0_47, %c0_48] : memref<3x40x24xf32, #tpu.memory_space<vmem>>, vector<1x40x24xf32>
    %107 = vector.shape_cast %106 : vector<1x40x24xf32> to vector<40x24xf32>
    %cst_49 = arith.constant dense<0.000000e+00> : vector<40x128xf32>
    %108 = tpu.matmul %107, %102, %cst_49 {dimension_numbers = #tpu.dot_dimension_numbers<[1], [0], [0], [1], [0, 0, 1, 1], [], []>} : vector<40x24xf32>, vector<24x128xf32>, vector<40x128xf32> -> vector<40x128xf32>
    %c1_50 = arith.constant 1 : index
    %c0_51 = arith.constant 0 : index
    %c0_52 = arith.constant 0 : index
    %109 = vector.load %arg6[%c1_50, %c0_51, %c0_52] : memref<3x40x24xf32, #tpu.memory_space<vmem>>, vector<1x40x24xf32>
    %110 = vector.shape_cast %109 : vector<1x40x24xf32> to vector<40x24xf32>
    %cst_53 = arith.constant dense<0.000000e+00> : vector<40x128xf32>
    %111 = tpu.matmul %110, %98, %cst_53 {dimension_numbers = #tpu.dot_dimension_numbers<[1], [0], [0], [1], [0, 0, 1, 1], [], []>} : vector<40x24xf32>, vector<24x128xf32>, vector<40x128xf32> -> vector<40x128xf32>
    %112 = arith.addf %108, %111 : vector<40x128xf32>
    %c2_54 = arith.constant 2 : index
    %c0_55 = arith.constant 0 : index
    %c0_56 = arith.constant 0 : index
    %113 = vector.load %arg6[%c2_54, %c0_55, %c0_56] : memref<3x40x24xf32, #tpu.memory_space<vmem>>, vector<1x40x24xf32>
    %114 = vector.shape_cast %113 : vector<1x40x24xf32> to vector<40x24xf32>
    %cst_57 = arith.constant dense<0.000000e+00> : vector<40x128xf32>
    %115 = tpu.matmul %114, %105, %cst_57 {dimension_numbers = #tpu.dot_dimension_numbers<[1], [0], [0], [1], [0, 0, 1, 1], [], []>} : vector<40x24xf32>, vector<24x128xf32>, vector<40x128xf32> -> vector<40x128xf32>
    %116 = arith.addf %112, %115 : vector<40x128xf32>
    %117 = vector.broadcast %99 : vector<40x1xf32> to vector<40x128xf32>
    %118 = arith.addf %116, %117 : vector<40x128xf32>
    %119 = vector.extract_strided_slice %3 {offsets = [0, 7], sizes = [40, 1], strides = [1, 1]} : vector<64x16xf32> to vector<40x1xf32>
    %120 = vector.extract_strided_slice %3 {offsets = [0, 8], sizes = [40, 1], strides = [1, 1]} : vector<64x16xf32> to vector<40x1xf32>
    %121 = vector.broadcast %2 : vector<1x128xf32> to vector<40x128xf32>
    %122 = arith.mulf %118, %121 : vector<40x128xf32>
    %cst_58 = arith.constant dense<0.000000e+00> : vector<40xf32>
    %123 = vector.multi_reduction <add>, %122, %cst_58 [1] : vector<40x128xf32> to vector<40xf32>
    %124 = vector.shape_cast %123 : vector<40xf32> to vector<40x1xf32>
    %cst_59 = arith.constant 3.125000e-02 : f32
    %125 = vector.broadcast %cst_59 : f32 to vector<40x1xf32>
    %126 = arith.mulf %124, %125 : vector<40x1xf32>
    %127 = arith.mulf %118, %122 : vector<40x128xf32>
    %cst_60 = arith.constant dense<0.000000e+00> : vector<40xf32>
    %128 = vector.multi_reduction <add>, %127, %cst_60 [1] : vector<40x128xf32> to vector<40xf32>
    %129 = vector.shape_cast %128 : vector<40xf32> to vector<40x1xf32>
    %cst_61 = arith.constant 3.125000e-02 : f32
    %130 = vector.broadcast %cst_61 : f32 to vector<40x1xf32>
    %131 = arith.mulf %129, %130 : vector<40x1xf32>
    %132 = arith.mulf %126, %126 : vector<40x1xf32>
    %133 = arith.subf %131, %132 : vector<40x1xf32>
    %cst_62 = arith.constant 9.99999974E-6 : f32
    %134 = vector.broadcast %cst_62 : f32 to vector<40x1xf32>
    %135 = arith.addf %133, %134 : vector<40x1xf32>
    %136 = math.rsqrt %135 : vector<40x1xf32>
    %137 = arith.mulf %119, %136 : vector<40x1xf32>
    %138 = arith.mulf %126, %137 : vector<40x1xf32>
    %139 = arith.subf %120, %138 : vector<40x1xf32>
    %140 = vector.broadcast %137 : vector<40x1xf32> to vector<40x128xf32>
    %141 = arith.mulf %118, %140 : vector<40x128xf32>
    %142 = vector.broadcast %139 : vector<40x1xf32> to vector<40x128xf32>
    %143 = arith.addf %141, %142 : vector<40x128xf32>
    %cst_63 = arith.constant 0.000000e+00 : f32
    %144 = vector.broadcast %cst_63 : f32 to vector<40x128xf32>
    %145 = arith.maximumf %143, %144 : vector<40x128xf32>
    %146 = arith.addf %145, %51 : vector<40x128xf32>
    %147 = vector.extract_strided_slice %3 {offsets = [0, 9], sizes = [64, 1], strides = [1, 1]} : vector<64x16xf32> to vector<64x1xf32>
    %c1_i32_64 = arith.constant 1 : i32
    %148 = tpu.dynamic_rotate %146 by %c1_i32_64 dim 1 : vector<40x128xf32>, i32 -> vector<40x128xf32>
    %149 = vector.broadcast %0 : vector<1x128xf32> to vector<40x128xf32>
    %150 = arith.mulf %148, %149 : vector<40x128xf32>
    %c127_i32_65 = arith.constant 127 : i32
    %151 = tpu.dynamic_rotate %146 by %c127_i32_65 dim 1 : vector<40x128xf32>, i32 -> vector<40x128xf32>
    %152 = vector.broadcast %1 : vector<1x128xf32> to vector<40x128xf32>
    %153 = arith.mulf %151, %152 : vector<40x128xf32>
    %c0_66 = arith.constant 0 : index
    %c0_67 = arith.constant 0 : index
    %c0_68 = arith.constant 0 : index
    %154 = vector.load %arg7[%c0_66, %c0_67, %c0_68] : memref<3x64x40xf32, #tpu.memory_space<vmem>>, vector<1x64x40xf32>
    %155 = vector.shape_cast %154 : vector<1x64x40xf32> to vector<64x40xf32>
    %cst_69 = arith.constant dense<0.000000e+00> : vector<64x128xf32>
    %156 = tpu.matmul %155, %150, %cst_69 {dimension_numbers = #tpu.dot_dimension_numbers<[1], [0], [0], [1], [0, 0, 1, 1], [], []>} : vector<64x40xf32>, vector<40x128xf32>, vector<64x128xf32> -> vector<64x128xf32>
    %c1_70 = arith.constant 1 : index
    %c0_71 = arith.constant 0 : index
    %c0_72 = arith.constant 0 : index
    %157 = vector.load %arg7[%c1_70, %c0_71, %c0_72] : memref<3x64x40xf32, #tpu.memory_space<vmem>>, vector<1x64x40xf32>
    %158 = vector.shape_cast %157 : vector<1x64x40xf32> to vector<64x40xf32>
    %cst_73 = arith.constant dense<0.000000e+00> : vector<64x128xf32>
    %159 = tpu.matmul %158, %146, %cst_73 {dimension_numbers = #tpu.dot_dimension_numbers<[1], [0], [0], [1], [0, 0, 1, 1], [], []>} : vector<64x40xf32>, vector<40x128xf32>, vector<64x128xf32> -> vector<64x128xf32>
    %160 = arith.addf %156, %159 : vector<64x128xf32>
    %c2_74 = arith.constant 2 : index
    %c0_75 = arith.constant 0 : index
    %c0_76 = arith.constant 0 : index
    %161 = vector.load %arg7[%c2_74, %c0_75, %c0_76] : memref<3x64x40xf32, #tpu.memory_space<vmem>>, vector<1x64x40xf32>
    %162 = vector.shape_cast %161 : vector<1x64x40xf32> to vector<64x40xf32>
    %cst_77 = arith.constant dense<0.000000e+00> : vector<64x128xf32>
    %163 = tpu.matmul %162, %153, %cst_77 {dimension_numbers = #tpu.dot_dimension_numbers<[1], [0], [0], [1], [0, 0, 1, 1], [], []>} : vector<64x40xf32>, vector<40x128xf32>, vector<64x128xf32> -> vector<64x128xf32>
    %164 = arith.addf %160, %163 : vector<64x128xf32>
    %165 = vector.broadcast %147 : vector<64x1xf32> to vector<64x128xf32>
    %166 = arith.addf %164, %165 : vector<64x128xf32>
    %c0_78 = arith.constant 0 : index
    %c0_79 = arith.constant 0 : index
    %167 = vector.load %arg9[%c0_78, %c0_79] : memref<64x128xf32, #tpu.memory_space<vmem>>, vector<64x128xf32>
    tpu.vector_store %arg9[%c0_78, %c0_79], %166 {strides = array<i32>} : memref<64x128xf32, #tpu.memory_space<vmem>>, vector<64x128xf32>,
    return
  }
}

</mosaic_0001>

<bundles_post_ra>
// kernel: synthetic_gradient_generator.1
= control target key start
LH: loop header
LB: loop body
LE: loop exit
PB: predicated region body
PF: predicated region fallthrough
CT: control target
= control target key end

     0   :  { %s1719_s13 = smov 127   ;;  %s1720_s18 = smov 1   ;;  %vm116_vm0 = vcmask 523264   ;;  %v1721_v32 = vmov 0   ;;  %s2461_s0 = inlined_call_operand.vmem [shape: f32[64,128], index: 0, kind: input, shape index: {}]   ;;  %s2462_s2 = inlined_call_operand.vmem [shape: f32[1,128], index: 2, kind: input, shape index: {}]   ;;  %s2463_s1 = inlined_call_operand.vmem [shape: f32[1,128], index: 1, kind: input, shape index: {}]   ;;  %s2464_s4 = inlined_call_operand.vmem [shape: f32[3,40,64], index: 4, kind: input, shape index: {}]   ;;  %s2465_s8 = inlined_call_operand.vmem [shape: f32[64,16], index: 8, kind: input, shape index: {}]   ;;  %s2466_s3 = inlined_call_operand.vmem [shape: f32[1,128], index: 3, kind: input, shape index: {}]   ;;  %s2467_s5 = inlined_call_operand.vmem [shape: f32[3,24,40], index: 5, kind: input, shape index: {}]   ;;  %s2468_s6 = inlined_call_operand.vmem [shape: f32[3,40,24], index: 6, kind: input, shape index: {}]   ;;  %s2469_s7 = inlined_call_operand.vmem [shape: f32[3,64,40], index: 7, kind: input, shape index: {}]   ;;  %s2470_s9 = inlined_call_operand.vmem [shape: f32[64,128], index: 9, kind: output, shape index: {}]  }
   0x1   :  { %v50_v0 = vld [vmem:[%s2461_s0 + $0x38] sm:$0xff]  ;;  %v48_v1 = vld [vmem:[%s2461_s0 + $0x28] sm:$0xff]  ;;  %v47_v2 = vld [vmem:[%s2461_s0 + $0x20] sm:$0xff]  ;;  %1654 = vset.pattern.permute.xlu1 %v1721_v32  ;;  %1656 = vset.pattern.permute.xlu0 %v1721_v32 }
   0x2   :  { %92 = vrot.lane.b32.xlu0 %v50_v0, %s1719_s13  ;;  %88 = vrot.lane.b32.xlu1 %v48_v1, %s1719_s13  ;;  %v49_v3 = vld [vmem:[%s2461_s0 + $0x30] sm:$0xff]  ;;  %v46_v4 = vld [vmem:[%s2461_s0 + $0x18] sm:$0xff] }
   0x3   :  { %86 = vrot.lane.b32.xlu2 %v47_v2, %s1719_s13  ;;  %140 = vmatpush.msra.mxu0 %v50_v0  ;;  %v45_v5 = vld [vmem:[%s2461_s0 + $0x10] sm:$0xff]  ;;  %v44_v6 = vld [vmem:[%s2461_s0 + $0x8] sm:$0xff]  ;;  %v43_v7 = vld [vmem:[%s2461_s0] sm:$0xff] }
   0x4   :  { %v1824_v9 = vld [vmem:[%s2462_s2] ss:$0 sm:$0xff]  ;;  %v1526_v20 = vld [vmem:[%s2464_s4 + $0x28] sm:$0xff]  ;;  %v1527_v24 = vld [vmem:[%s2464_s4 + $0x30] sm:$0xff]  ;;  %1655 = vset.pattern.permute.xlu2 %v1721_v32 }
   0x5   :  { %141 = vmatpush.msra.mxu0 %v49_v3  ;;  %v1830_v14 = vld [vmem:[%s2463_s1] ss:$0 sm:$0xff]  ;;  %v1528_v33 = vld [vmem:[%s2464_s4 + $0x38] sm:$0xff]  ;;  %v1864_v39 = vld [vmem:[%s2465_s8 + $0x8] sm:$0xff] }
   0x6   :  { %v1851_v31 = vld [vmem:[%s2465_s8 + $0x20] sm:$0xff]  ;;  %v1541_v47 = vld [vmem:[%s2464_s4 + $0x50] sm:$0xff]  ;;  %v1886_v49 = vld [vmem:[%s2465_s8 + $0x18] sm:$0xff] }
   0x7   :  { %142 = vmatpush.msra.mxu0 %v48_v1  ;;  %v1529_v41 = vld [vmem:[%s2464_s4 + $0x40] sm:$0xff]  ;;  %v1881_v48 = vld [vmem:[%s2465_s8 + $0x10] sm:$0xff]  ;;  %v1530_v50 = vld [vmem:[%s2464_s4 + $0x48] sm:$0xff] }
   0x8   :  { %v105_v53 = vld [vmem:[%s2464_s4] sm:$0xff]  ;;  %v106_v54 = vld [vmem:[%s2464_s4 + $0x8] sm:$0xff]  ;;  %v1542_v55 = vld [vmem:[%s2464_s4 + $0x58] sm:$0xff] }
   0x9   :  { %143 = vmatpush.msra.mxu0 %v47_v2  ;;  %v1909_v56 = vld [vmem:[%s2465_s8] sm:$0xff]  ;;  %v107_v57 = vld [vmem:[%s2464_s4 + $0x10] sm:$0xff]  ;;  %v108_v59 = vld [vmem:[%s2464_s4 + $0x18] sm:$0xff] }
   0xa   :  { %90 = vrot.lane.b32.xlu0 %v49_v3, %s1719_s13  ;;  %65 = vrot.lane.b32.xlu1 %v50_v0, %s1720_s18  ;;  %v1543_v58 = vld [vmem:[%s2464_s4 + $0x60] sm:$0xff]  ;;  %v1544_v60 = vld [vmem:[%s2464_s4 + $0x68] sm:$0xff] }
   0xb   :  { %63 = vrot.lane.b32.xlu2 %v49_v3, %s1720_s18  ;;  %144 = vmatpush.msra.mxu0 %v46_v4  ;;  %v109_v61 = vld [vmem:[%s2464_s4 + $0x20] sm:$0xff]  ;;  %v1545_v62 = vld [vmem:[%s2464_s4 + $0x70] sm:$0xff] }
   0xd   :  { %145 = vmatpush.msra.mxu0 %v45_v5 }
   0xf   :  { %146 = vmatpush.msra.mxu0 %v44_v6 }
  0x11   :  { %147 = vmatpush.msra.mxu0 %v43_v7 }
  0x12   :  { %84 = vrot.lane.b32.xlu0 %v46_v4, %s1719_s13  ;;  %61 = vrot.lane.b32.xlu1 %v48_v1, %s1720_s18 }
  0x13   :  { %82 = vrot.lane.b32.xlu2 %v45_v5, %s1719_s13  ;;  %1531 = vmatmul.msk.f32.vlgmr.msra.gmra.mxu0 %vm116_vm0, %v1526_v20 }
  0x1a   :  { %59 = vrot.lane.b32.xlu0 %v47_v2, %s1720_s18  ;;  %80 = vrot.lane.b32.xlu1 %v44_v6, %s1719_s13 }
  0x1b   :  { %57 = vrot.lane.b32.xlu2 %v46_v4, %s1720_s18  ;;  %1532 = vmatmul.msk.f32.gmra.mxu0 %vm116_vm0, %v1527_v24 }
  0x22   :  { %78 = vrot.lane.b32.xlu0 %v43_v7, %s1719_s13  ;;  %55 = vrot.lane.b32.xlu1 %v45_v5, %s1720_s18 }
  0x23   :  { %53 = vrot.lane.b32.xlu2 %v44_v6, %s1720_s18  ;;  %1533 = vmatmul.msk.f32.gmra.mxu0 %vm116_vm0, %v1528_v33 }
  0x2a   :  { %51 = vrot.lane.b32.xlu0 %v43_v7, %s1720_s18  ;;  %291 = vperm.xlu1 %1654, %v1851_v31  }
  0x2b   :  { %1534 = vmatmul.msk.f32.gmra.mxu0 %vm116_vm0, %v1529_v41  ;;  %286 = vperm.xlu2 %1655, %v1886_v49  }
  0x32   :  { %276 = vperm.xlu1 %1654, %v1864_v39   ;;  %281 = vperm.xlu0 %1656, %v1881_v48  }
  0x33   :  { %1535 = vmatmul.msk.f32.gmra.mxu0 %vm116_vm0, %v1530_v50  ;;  %271 = vperm.xlu2 %1655, %v1909_v56  }
  0x5d   :  { %v87_v8 = vpop.permute.xlu2 %86 }
  0x5e   :  { %v101_v23 = vmul.f32 %v1824_v9, %v87_v8 }
  0x65   :  { %v64_v10 = vpop.permute.xlu2 %63 }
  0x66   :  { %v76_v19 = vmul.f32 %v1830_v14, %v64_v10 }
  0x6d   :  { %v83_v21 = vpop.permute.xlu2 %82 }
  0x6e   :  { %v99_v29 = vmul.f32 %v1824_v9, %v83_v21 }
  0x74   :  { %v93_v11 = vpop.permute.xlu0 %92  ;;  %v89_v12 = vpop.permute.xlu1 %88 }
  0x75   :  { %v104_v13 = vmul.f32 %v1824_v9, %v93_v11  ;;  %v102_v22 = vmul.f32 %v1824_v9, %v89_v12  ;;  %v58_v30 = vpop.permute.xlu2 %57  ;;  %v1942_v11 = vld [vmem:[%s2466_s3] ss:$0 sm:$0xff] }
  0x76   :  { %v73_v38 = vmul.f32 %v1830_v14, %v58_v30 }
  0x77   :  { %240 = vmatpush.msra.mxu2 %v104_v13 }
  0x7c   :  { %v91_v15 = vpop.permute.xlu0 %90  ;;  %v66_v16 = vpop.permute.xlu1 %65 }
  0x7d   :  { %v103_v17 = vmul.f32 %v1824_v9, %v91_v15  ;;  %v77_v18 = vmul.f32 %v1830_v14, %v66_v16  ;;  %v54_v40 = vpop.permute.xlu2 %53 }
  0x7e   :  { %v71_v46 = vmul.f32 %v1830_v14, %v54_v40 }
  0x7f   :  { %241 = vmatpush.msra.mxu2 %v103_v17  ;;  %187 = vmatpush.msra.mxu1 %v77_v18 }
  0x80   :  { %1631 = vmatpush.msra.mxu3 %v77_v18 }
  0x81   :  { %242 = vmatpush.msra.mxu2 %v102_v22  ;;  %188 = vmatpush.msra.mxu1 %v76_v19 }
  0x82   :  { %1632 = vmatpush.msra.mxu3 %v76_v19 }
  0x83   :  { %243 = vmatpush.msra.mxu2 %v101_v23 }
  0x84   :  { %v85_v25 = vpop.permute.xlu0 %84  ;;  %v62_v26 = vpop.permute.xlu1 %61 }
  0x85   :  { %v100_v27 = vmul.f32 %v1824_v9, %v85_v25  ;;  %v75_v28 = vmul.f32 %v1830_v14, %v62_v26 }
  0x87   :  { %244 = vmatpush.msra.mxu2 %v100_v27  ;;  %189 = vmatpush.msra.mxu1 %v75_v28  ;;  %v287_v27 = vpop.permute.xlu2 %286 }
  0x88   :  { %1633 = vmatpush.msra.mxu3 %v75_v28 }
  0x89   :  { %245 = vmatpush.msra.mxu2 %v99_v29 }
  0x8c   :  { %v60_v34 = vpop.permute.xlu0 %59  ;;  %v81_v35 = vpop.permute.xlu1 %80 }
  0x8d   :  { %v74_v36 = vmul.f32 %v1830_v14, %v60_v34  ;;  %v98_v37 = vmul.f32 %v1824_v9, %v81_v35 }
  0x8f   :  { %190 = vmatpush.msra.mxu1 %v74_v36  ;;  %1634 = vmatpush.msra.mxu3 %v74_v36 }
  0x90   :  { %246 = vmatpush.msra.mxu2 %v98_v37  ;;  %v149_v63 = vpop.f32.mrf.mxu0 }
  0x91   :  { %191 = vmatpush.msra.mxu1 %v73_v38  ;;  %1635 = vmatpush.msra.mxu3 %v73_v38 }
  0x94   :  { %v79_v42 = vpop.permute.xlu0 %78  ;;  %v56_v43 = vpop.permute.xlu1 %55 }
  0x95   :  { %v97_v44 = vmul.f32 %v1824_v9, %v79_v42  ;;  %v72_v45 = vmul.f32 %v1830_v14, %v56_v43  ;;  %v272_v42 = vpop.permute.xlu2 %271 }
  0x97   :  { %247 = vmatpush.msra.mxu2 %v97_v44  ;;  %192 = vmatpush.msra.mxu1 %v72_v45 }
  0x98   :  { %1546 = vmatmul.msk.f32.vlgmr.msra.gmra.mxu2 %vm116_vm0, %v1541_v47  ;;  %1636 = vmatpush.msra.mxu3 %v72_v45  ;;  %v152_v2 = vpop.f32.mrf.mxu0 }
  0x99   :  { %193 = vmatpush.msra.mxu1 %v71_v46 }
  0x9a   :  { %1637 = vmatpush.msra.mxu3 %v71_v46 }
  0x9c   :  { %v52_v51 = vpop.permute.xlu0 %51  ;;  %v292_v0 = vpop.permute.xlu1 %291 }
  0x9d   :  { %v70_v52 = vmul.f32 %v1830_v14, %v52_v51 }
  0x9f   :  { %194 = vmatpush.msra.mxu1 %v70_v52  ;;  %1638 = vmatpush.msra.mxu3 %v70_v52 }
  0xa0   :  { %1536 = vmatmul.msk.f32.vlgmr.msra.gmra.mxu1 %vm116_vm0, %v105_v53  ;;  %1537 = vmatmul.msk.f32.vlgmr.msra.gmra.mxu3 %vm116_vm0, %v106_v54  ;;  %v155_v7 = vpop.f32.mrf.mxu0 }
  0xa1   :  { %1547 = vmatmul.msk.f32.gmra.mxu2 %vm116_vm0, %v1542_v55 }
  0xa4   :  { %v277_v6 = vpop.permute.xlu1 %276  ;;  %v282_v17 = vpop.permute.xlu0 %281 }
  0xa8   :  { %1538 = vmatmul.msk.f32.gmra.mxu3 %vm116_vm0, %v107_v57  ;;  %v158_v19 = vpop.f32.mrf.mxu0 }
  0xa9   :  { %1548 = vmatmul.msk.f32.gmra.mxu2 %vm116_vm0, %v1543_v58 }
  0xb0   :  { %1539 = vmatmul.msk.f32.gmra.mxu3 %vm116_vm0, %v108_v59  ;;  %v161_v30 = vpop.f32.mrf.mxu0 }
  0xb1   :  { %1549 = vmatmul.msk.f32.gmra.mxu2 %vm116_vm0, %v1544_v60 }
  0xb8   :  { %1540 = vmatmul.msk.f32.gmra.mxu3 %vm116_vm0, %v109_v61 }
  0xb9   :  { %1550 = vmatmul.msk.f32.gmra.mxu2 %vm116_vm0, %v1545_v62  ;;  %vm544_vm0 = vcmask 326656  }
 0x11b   :  { %v249_v1 = vpop.f32.mrf.mxu2 }
 0x11d   :  { %v196_v29 = vpop.f32.mrf.mxu1 }
 0x11e   :  { %v197_v34 = vadd.f32 %v196_v29, %v149_v63 }
 0x120   :  { %v264_v40 = vadd.f32 %v249_v1, %v197_v34 }
 0x122   :  { %v1961_v45 = vadd.f32 %v272_v42, %v264_v40 }
 0x123   :  { %v199_v3 = vpop.f32.mrf.mxu3 }
 0x124   :  { %v200_v4 = vadd.f32 %v199_v3, %v152_v2  ;;  %v252_v5 = vpop.f32.mrf.mxu2  ;;  %v302_v47 = vmul.f32 %v1942_v11, %v1961_v45 }
 0x126   :  { %v265_v8 = vadd.f32 %v252_v5, %v200_v4  ;;  %v322_v50 = vmul.f32 %v302_v47, %v1961_v45  ;;  %v1722_v5 = vmov 1  }
 0x127   :  { %1657 = vset.pattern.permute.xlu2 %v1722_v5  ;;  %1658 = vset.pattern.permute.xlu1 %v1722_v5 }
 0x128   :  { %v1937_v10 = vadd.f32 %v277_v6, %v265_v8 }
 0x12a   :  { %v303_v12 = vmul.f32 %v1942_v11, %v1937_v10 }
 0x12b   :  { %v202_v13 = vpop.f32.mrf.mxu3 }
 0x12c   :  { %v203_v15 = vadd.f32 %v202_v13, %v155_v7  ;;  %309 = vadd.xlane.f32.xlu2 %v303_v12  ;;  %v255_v16 = vpop.f32.mrf.mxu2  ;;  %v323_v43 = vmul.f32 %v303_v12, %v1937_v10 }
 0x12e   :  { %v266_v18 = vadd.f32 %v255_v16, %v203_v15 }
 0x130   :  { %v1946_v20 = vadd.f32 %v282_v17, %v266_v18 }
 0x132   :  { %v304_v21 = vmul.f32 %v1942_v11, %v1946_v20 }
 0x133   :  { %v205_v22 = vpop.f32.mrf.mxu3 }
 0x134   :  { %v206_v23 = vadd.f32 %v205_v22, %v158_v19  ;;  %311 = vadd.xlane.f32.xlu2 %v304_v21  ;;  %v258_v24 = vpop.f32.mrf.mxu2  ;;  %v324_v25 = vmul.f32 %v304_v21, %v1946_v20 }
 0x136   :  { %v267_v26 = vadd.f32 %v258_v24, %v206_v23  ;;  %331 = vadd.xlane.f32.xlu0 %v324_v25 }
 0x138   :  { %v1951_v28 = vadd.f32 %v287_v27, %v267_v26 }
 0x13a   :  { %v305_v32 = vmul.f32 %v1942_v11, %v1951_v28 }
 0x13b   :  { %v208_v33 = vpop.f32.mrf.mxu3 }
 0x13c   :  { %v209_v35 = vadd.f32 %v208_v33, %v161_v30  ;;  %313 = vadd.xlane.f32.xlu2 %v305_v32  ;;  %v261_v36 = vpop.f32.mrf.mxu2  ;;  %v325_v37 = vmul.f32 %v305_v32, %v1951_v28 }
 0x13e   :  { %v268_v38 = vadd.f32 %v261_v36, %v209_v35  ;;  %333 = vadd.xlane.f32.xlu1 %v325_v37 }
 0x140   :  { %v1956_v41 = vadd.f32 %v292_v0, %v268_v38 }
 0x142   :  { %v306_v44 = vmul.f32 %v1942_v11, %v1956_v41 }
 0x144   :  { %329 = vadd.xlane.f32.xlu2 %v323_v43  ;;  %v326_v46 = vmul.f32 %v306_v44, %v1956_v41 }
 0x146   :  { %315 = vadd.xlane.f32.xlu1 %v306_v44  ;;  %335 = vadd.xlane.f32.xlu0 %v326_v46 }
 0x14e   :  { %307 = vadd.xlane.f32.xlu1 %v302_v47  ;;  %327 = vadd.xlane.f32.xlu0 %v322_v50 }
 0x19f   :  { %v310_v51 = vpop.xlane.xlu2 %309 }
 0x1a0   :  { %v1971_v1 = vmul.f32 0.03125, %v310_v51 }
 0x1a2   :  { %v343_v8 = vmul.f32 %v1971_v1, %v1971_v1 }
 0x1a7   :  { %v312_v52 = vpop.xlane.xlu2 %311 }
 0x1a8   :  { %v319_v53 = vmul.f32 0.03125, %v312_v52 }
 0x1a9   :  { %v332_v54 = vpop.xlane.xlu0 %331 }
 0x1aa   :  { %v344_v55 = vmul.f32 %v319_v53, %v319_v53  ;;  %v339_v57 = vmul.f32 0.03125, %v332_v54 }
 0x1ac   :  { %v349_v58 = vsub.f32 %v339_v57, %v344_v55 }
 0x1ae   :  { %v354_v59 = vadd.f32 1e-05, %v349_v58 }
 0x1af   :  { %v314_v60 = vpop.xlane.xlu2 %313 }
 0x1b0   :  { %1685 = vrsqrt.f32 %v354_v59  ;;  %v1967_v61 = vmul.f32 0.03125, %v314_v60  ;;  %vm383_vm2 = vweird.f32 %v354_v59 }
 0x1b1   :  { %v334_v62 = vpop.xlane.xlu1 %333 }
 0x1b2   :  { %v345_v63 = vmul.f32 %v1967_v61, %v1967_v61  ;;  %v340_v0 = vmul.f32 0.03125, %v334_v62 }
 0x1b4   :  { %v350_v2 = vsub.f32 %v340_v0, %v345_v63 }
 0x1b6   :  { %v1686_v3 = vpop.eup %1685  ;;  %v355_v4 = vadd.f32 1e-05, %v350_v2 }
 0x1b7   :  { %v378_v6 = vmul.f32 %v1686_v3, %v354_v59  ;;  %v330_v7 = vpop.xlane.xlu2 %329  ;;  %vm384_vm1 = vweird.f32 %v1686_v3 }
 0x1b8   :  { %1687 = vrsqrt.f32 %v355_v4  ;;  %v338_v12 = vmul.f32 0.03125, %v330_v7  ;;  %vm385_vm3 = vmor %vm383_vm2, %vm384_vm1  ;;  %vm393_vm5 = vweird.f32 %v355_v4 }
 0x1b9   :  { %v379_v13 = vmul.f32 %v1686_v3, %v378_v6  ;;  %v316_v15 = vpop.xlane.xlu1 %315  ;;  %v336_v16 = vpop.xlane.xlu0 %335 }
 0x1ba   :  { %v348_v17 = vsub.f32 %v338_v12, %v343_v8  ;;  %v1977_v18 = vmul.f32 0.03125, %v316_v15  ;;  %v341_v23 = vmul.f32 0.03125, %v336_v16 }
 0x1bb   :  { %v380_v19 = vmul.f32 0.5, %v379_v13 }
 0x1bc   :  { %v353_v21 = vadd.f32 1e-05, %v348_v17  ;;  %v346_v22 = vmul.f32 %v1977_v18, %v1977_v18 }
 0x1bd   :  { %v381_v24 = vsub.f32 1.5, %v380_v19 }
 0x1be   :  { %v1688_v25 = vpop.eup %1687  ;;  %1689 = vrsqrt.f32 %v353_v21  ;;  %v351_v26 = vsub.f32 %v341_v23, %v346_v22  ;;  %vm373_vm11 = vweird.f32 %v353_v21 }
 0x1bf   :  { %v388_v27 = vmul.f32 %v1688_v25, %v355_v4  ;;  %v382_v29 = vmul.f32 %v1686_v3, %v381_v24  ;;  %vm394_vm4 = vweird.f32 %v1688_v25 }
 0x1c0   :  { %v356_v30 = vadd.f32 1e-05, %v351_v26  ;;  %vm395_vm6 = vmor %vm393_vm5, %vm394_vm4 }
 0x1c1   :  { %v389_v32 = vmul.f32 %v1688_v25, %v388_v27  ;;  %v308_v33 = vpop.xlane.xlu1 %307  ;;  %v328_v34 = vpop.xlane.xlu0 %327  ;;  %v386_v35 = vsel %vm385_vm3, %v1686_v3, %v382_v29 }
 0x1c2   :  { %1691 = vrsqrt.f32 %v356_v30  ;;  %v317_v36 = vmul.f32 0.03125, %v308_v33  ;;  %v409_v38 = vmul.f32 %v386_v35, %v1881_v48  ;;  %v337_v43 = vmul.f32 0.03125, %v328_v34 }
 0x1c3   :  { %v390_v37 = vmul.f32 0.5, %v389_v32  ;;  %vm403_vm8 = vweird.f32 %v356_v30 }
 0x1c4   :  { %v1690_v40 = vpop.eup %1689  ;;  %v342_v42 = vmul.f32 %v317_v36, %v317_v36  ;;  %v414_v47 = vmul.f32 %v409_v38, %v319_v53 }
 0x1c5   :  { %v391_v44 = vsub.f32 1.5, %v390_v37  ;;  %v368_v46 = vmul.f32 %v1690_v40, %v353_v21  ;;  %vm374_vm10 = vweird.f32 %v1690_v40 }
 0x1c6   :  { %v347_v50 = vsub.f32 %v337_v43, %v342_v42  ;;  %426 = vrot.lane.b32.xlu0 %v414_v47, %s1720_s18  ;;  %vm375_vm12 = vmor %vm373_vm11, %vm374_vm10  ;;  %vm824_vm10 = vcmask 195584  }
 0x1c7   :  { %v369_v51 = vmul.f32 %v1690_v40, %v368_v46  ;;  %v392_v52 = vmul.f32 %v1688_v25, %v391_v44 }
 0x1c8   :  { %v1692_v54 = vpop.eup %1691  ;;  %v352_v55 = vadd.f32 1e-05, %v347_v50 }
 0x1c9   :  { %v398_v57 = vmul.f32 %v1692_v54, %v356_v30  ;;  %v396_v58 = vsel %vm395_vm6, %v1688_v25, %v392_v52  ;;  %v370_v60 = vmul.f32 0.5, %v369_v51  ;;  %vm404_vm7 = vweird.f32 %v1692_v54 }
 0x1ca   :  { %1693 = vrsqrt.f32 %v352_v55  ;;  %v410_v59 = vmul.f32 %v396_v58, %v1886_v49  ;;  %vm405_vm9 = vmor %vm403_vm8, %vm404_vm7  ;;  %vm363_vm14 = vweird.f32 %v352_v55 }
 0x1cb   :  { %v399_v62 = vmul.f32 %v1692_v54, %v398_v57  ;;  %v371_v53 = vsub.f32 1.5, %v370_v60 }
 0x1cc   :  { %v415_v63 = vmul.f32 %v410_v59, %v1967_v61 }
 0x1cd   :  { %v400_v0 = vmul.f32 0.5, %v399_v62  ;;  %v372_v12 = vmul.f32 %v1690_v40, %v371_v53 }
 0x1ce   :  { %428 = vrot.lane.b32.xlu2 %v415_v63, %s1720_s18 }
 0x1cf   :  { %v401_v2 = vsub.f32 1.5, %v400_v0  ;;  %v376_v17 = vsel %vm375_vm12, %v1690_v40, %v372_v12  ;;  %v1552_v0 = vld [vmem:[%s2467_s5 + $0x20] sm:$0xff] }
 0x1d0   :  { %v1694_v3 = vpop.eup %1693  ;;  %v408_v22 = vmul.f32 %v376_v17, %v1864_v39 }
 0x1d1   :  { %v358_v4 = vmul.f32 %v1694_v3, %v352_v55  ;;  %v402_v6 = vmul.f32 %v1692_v54, %v401_v2  ;;  %vm364_vm13 = vweird.f32 %v1694_v3  ;;  %v1553_v2 = vld [vmem:[%s2467_s5 + $0x28] sm:$0xff] }
 0x1d2   :  { %vm365_vm15 = vmor %vm363_vm14, %vm364_vm13  ;;  %v413_v21 = vmul.f32 %v408_v22, %v1971_v1 }
 0x1d3   :  { %v359_v7 = vmul.f32 %v1694_v3, %v358_v4  ;;  %v406_v8 = vsel %vm405_vm9, %v1692_v54, %v402_v6 }
 0x1d4   :  { %v411_v13 = vmul.f32 %v406_v8, %v1851_v31 }
 0x1d5   :  { %v360_v15 = vmul.f32 0.5, %v359_v7 }
 0x1d6   :  { %464 = vperm.xlu2 %1657, %v411_v13   ;;  %v416_v61 = vmul.f32 %v411_v13, %v1977_v18  ;;  %v1723_v18 = vmov 2  }
 0x1d7   :  { %v361_v16 = vsub.f32 1.5, %v360_v15  ;;  %1660 = vset.pattern.permute.xlu0 %v1723_v18 }
 0x1d8   :  { %430 = vrot.lane.b32.xlu1 %v416_v61, %s1720_s18 }
 0x1d9   :  { %v362_v19 = vmul.f32 %v1694_v3, %v361_v16 }
 0x1db   :  { %v366_v23 = vsel %vm365_vm15, %v1694_v3, %v362_v19 }
 0x1dc   :  { %v407_v24 = vmul.f32 %v366_v23, %v1909_v56  ;;  %v537_v23 = vld [vmem:[%s2467_s5] sm:$0xff] }
 0x1de   :  { %454 = vperm.xlu2 %1657, %v409_v38   ;;  %v412_v25 = vmul.f32 %v407_v24, %v317_v36 }
 0x1e0   :  { %424 = vrot.lane.b32.xlu1 %v413_v21, %s1720_s18  ;;  %422 = vrot.lane.b32.xlu0 %v412_v25, %s1720_s18 }
 0x1e6   :  { %449 = vperm.xlu2 %1657, %v408_v22  }
 0x1e8   :  { %459 = vperm.xlu1 %1658, %v410_v59  }
 0x1ee   :  { %1662 = vset.pattern.permute.xlu2 %v1723_v18 }
 0x1f0   :  { %1659 = vset.pattern.permute.xlu1 %v1723_v18  ;;  %v538_v18 = vld [vmem:[%s2467_s5 + $0x8] sm:$0xff] }
 0x228   :  { %v429_v29 = vpop.permute.xlu2 %428 }
 0x229   :  { %v440_v30 = vsub.f32 %v1886_v49, %v429_v29 }
 0x230   :  { %v465_v37 = vpop.permute.xlu2 %464 }
 0x238   :  { %v427_v26 = vpop.permute.xlu0 %426  ;;  %v455_v38 = vpop.permute.xlu2 %454 }
 0x239   :  { %v439_v27 = vsub.f32 %v1881_v48, %v427_v26  ;;  %v469_v43 = vmul.f32 %v455_v38, %v1946_v20 }
 0x23b   :  { %484 = vperm.xlu1 %1659, %v439_v27  }
 0x240   :  { %v450_v42 = vpop.permute.xlu2 %449 }
 0x243   :  { %489 = vperm.xlu1 %1659, %v440_v30   ;;  %v1560_v30 = vld [vmem:[%s2467_s5 + $0x30] sm:$0xff] }
 0x24a   :  { %v431_v1 = vpop.permute.xlu1 %430 }
 0x24b   :  { %v441_v32 = vsub.f32 %v1851_v31, %v431_v1  ;;  %v468_v31 = vmul.f32 %v450_v42, %v1937_v10  ;;  %v471_v10 = vmul.f32 %v465_v37, %v1956_v41  ;;  %v539_v1 = vld [vmem:[%s2467_s5 + $0x10] sm:$0xff] }
 0x24d   :  { %494 = vperm.xlu0 %1660, %v441_v32   ;;  %v1561_v32 = vld [vmem:[%s2467_s5 + $0x38] sm:$0xff] }
 0x252   :  { %v425_v33 = vpop.permute.xlu1 %424  ;;  %v423_v34 = vpop.permute.xlu0 %422 }
 0x253   :  { %v438_v35 = vsub.f32 %v1864_v39, %v425_v33  ;;  %v437_v36 = vsub.f32 %v1909_v56, %v423_v34 }
 0x255   :  { %479 = vperm.xlu2 %1662, %v438_v35   ;;  %1661 = vset.pattern.permute.xlu0 %v1722_v5 }
 0x256   :  { %474 = vperm.xlu1 %1659, %v437_v36   ;;  %444 = vperm.xlu0 %1661, %v407_v24   ;;  %v1724_v24 = vmov 3  }
 0x25a   :  { %v460_v40 = vpop.permute.xlu1 %459 }
 0x25b   :  { %v470_v5 = vmul.f32 %v460_v40, %v1951_v28 }
 0x25d   :  { %1665 = vset.pattern.permute.xlu2 %v1724_v24 }
 0x25e   :  { %1664 = vset.pattern.permute.xlu0 %v1724_v24  ;;  %1663 = vset.pattern.permute.xlu1 %v1724_v24 }
 0x2ad   :  { %v485_v44 = vpop.permute.xlu1 %484 }
 0x2ae   :  { %v499_v46 = vadd.f32 %v485_v44, %v469_v43 }
 0x2af   :  { %v480_v47 = vpop.permute.xlu2 %479 }
 0x2b0   :  { %v498_v50 = vadd.f32 %v480_v47, %v468_v31  ;;  %v2002_v51 = vmax.f32 %v499_v46, 0.0 }
 0x2b2   :  { %v2004_v52 = vmax.f32 %v498_v50, 0.0  ;;  %511 = vrot.lane.b32.xlu0 %v2002_v51, %s1720_s18 }
 0x2b4   :  { %509 = vrot.lane.b32.xlu2 %v2004_v52, %s1720_s18 }
 0x2b5   :  { %v490_v54 = vpop.permute.xlu1 %489 }
 0x2b6   :  { %v500_v20 = vadd.f32 %v490_v54, %v470_v5 }
 0x2b8   :  { %v2011_v55 = vmax.f32 %v500_v20, 0.0 }
 0x2ba   :  { %513 = vrot.lane.b32.xlu1 %v2011_v55, %s1720_s18 }
 0x2bf   :  { %v495_v57 = vpop.permute.xlu0 %494 }
 0x2c0   :  { %v501_v58 = vadd.f32 %v495_v57, %v471_v10 }
 0x2c2   :  { %v2016_v59 = vmax.f32 %v501_v58, 0.0 }
 0x2c4   :  { %530 = vrot.lane.b32.xlu0 %v2016_v59, %s1719_s13  ;;  %515 = vrot.lane.b32.xlu2 %v2016_v59, %s1720_s18 }
 0x2c5   :  { %565 = vmatpush.msrb.mxu3 %v2016_v59 }
 0x2c7   :  { %566 = vmatpush.msrb.mxu3 %v2011_v55 }
 0x2c8   :  { %v445_v28 = vpop.permute.xlu0 %444  ;;  %v475_v41 = vpop.permute.xlu1 %474 }
 0x2c9   :  { %567 = vmatpush.msrb.mxu3 %v2002_v51  ;;  %v467_v60 = vmul.f32 %v445_v28, %v1961_v45  ;;  %v1551_v45 = vld [vmem:[%s2467_s5 + $0x18] sm:$0xff] }
 0x2cb   :  { %v497_v62 = vadd.f32 %v475_v41, %v467_v60  ;;  %568 = vmatpush.msrb.mxu3 %v2004_v52 }
 0x2cc   :  { %524 = vrot.lane.b32.xlu0 %v2004_v52, %s1719_s13  ;;  %528 = vrot.lane.b32.xlu2 %v2011_v55, %s1719_s13 }
 0x2cd   :  { %v2031_v63 = vmax.f32 %v497_v62, 0.0 }
 0x2cf   :  { %507 = vrot.lane.b32.xlu1 %v2031_v63, %s1720_s18  ;;  %569 = vmatpush.msrb.mxu3 %v2031_v63 }
 0x2d0   :  { %1554 = vmatmul.msk.f32.vlgmr.msrb.gmra.mxu3 %vm544_vm0, %v1551_v45 }
 0x2d4   :  { %522 = vrot.lane.b32.xlu2 %v2031_v63, %s1719_s13  ;;  %662 = vperm.xlu0 %1664, %v1864_v39  }
 0x2d7   :  { %526 = vrot.lane.b32.xlu1 %v2002_v51, %s1719_s13 }
 0x2d8   :  { %1555 = vmatmul.msk.f32.gmra.mxu3 %vm544_vm0, %v1552_v0 }
 0x2dc   :  { %658 = vperm.xlu2 %1665, %v1909_v56  }
 0x2df   :  { %666 = vperm.xlu1 %1663, %v1881_v48  }
 0x2e0   :  { %1556 = vmatmul.msk.f32.gmra.mxu3 %vm544_vm0, %v1553_v2 }
 0x30e   :  { %v510_v53 = vpop.permute.xlu2 %509 }
 0x30f   :  { %v518_v13 = vmul.f32 %v1830_v14, %v510_v53 }
 0x31e   :  { %v516_v3 = vpop.permute.xlu2 %515 }
 0x31f   :  { %v521_v4 = vmul.f32 %v1830_v14, %v516_v3 }
 0x321   :  { %600 = vmatpush.msra.mxu3 %v521_v4 }
 0x324   :  { %v512_v6 = vpop.permute.xlu0 %511 }
 0x325   :  { %v519_v12 = vmul.f32 %v1830_v14, %v512_v6 }
 0x326   :  { %v529_v15 = vpop.permute.xlu2 %528 }
 0x327   :  { %v535_v17 = vmul.f32 %v1824_v9, %v529_v15 }
 0x32c   :  { %v514_v7 = vpop.permute.xlu1 %513 }
 0x32d   :  { %v520_v8 = vmul.f32 %v1830_v14, %v514_v7 }
 0x32e   :  { %v523_v26 = vpop.permute.xlu2 %522 }
 0x32f   :  { %601 = vmatpush.msra.mxu3 %v520_v8  ;;  %v532_v29 = vmul.f32 %v1824_v9, %v523_v26 }
 0x331   :  { %602 = vmatpush.msra.mxu3 %v519_v12 }
 0x333   :  { %603 = vmatpush.msra.mxu3 %v518_v13 }
 0x336   :  { %v531_v61 = vpop.permute.xlu0 %530  ;;  %v659_v41 = vpop.permute.xlu2 %658 }
 0x337   :  { %v536_v16 = vmul.f32 %v1824_v9, %v531_v61 }
 0x339   :  { %639 = vmatpush.msrb.mxu0 %v536_v16 }
 0x33b   :  { %640 = vmatpush.msrb.mxu0 %v535_v17 }
 0x33e   :  { %v525_v21 = vpop.permute.xlu0 %524 }
 0x33f   :  { %v533_v27 = vmul.f32 %v1824_v9, %v525_v21 }
 0x341   :  { %v508_v19 = vpop.permute.xlu1 %507 }
 0x342   :  { %v517_v22 = vmul.f32 %v1830_v14, %v508_v19 }
 0x344   :  { %604 = vmatpush.msra.mxu3 %v517_v22  ;;  %v1725_v22 = vmov 4  }
 0x345   :  { %1557 = vmatmul.msk.f32.vlgmr.msra.gmra.mxu3 %vm544_vm0, %v537_v23  ;;  %1667 = vset.pattern.permute.xlu2 %v1725_v22 }
 0x346   :  { %v663_v43 = vpop.permute.xlu0 %662  ;;  %1666 = vset.pattern.permute.xlu0 %v1725_v22 }
 0x349   :  { %v527_v25 = vpop.permute.xlu1 %526 }
 0x34a   :  { %v534_v14 = vmul.f32 %v1824_v9, %v527_v25  ;;  %v1562_v9 = vld [vmem:[%s2467_s5 + $0x40] sm:$0xff] }
 0x34c   :  { %641 = vmatpush.msrb.mxu0 %v534_v14 }
 0x34d   :  { %1558 = vmatmul.msk.f32.gmra.mxu3 %vm544_vm0, %v538_v18 }
 0x34e   :  { %642 = vmatpush.msrb.mxu0 %v533_v27 }
 0x350   :  { %643 = vmatpush.msrb.mxu0 %v532_v29 }
 0x351   :  { %1563 = vmatmul.msk.f32.vlgmr.msrb.gmra.mxu0 %vm544_vm0, %v1560_v30  ;;  %v667_v54 = vpop.permute.xlu1 %666 }
 0x353   :  { %v571_v33 = vpop.f32.mrf.mxu3 }
 0x355   :  { %1559 = vmatmul.msk.f32.gmra.mxu3 %vm544_vm0, %v539_v1 }
 0x359   :  { %1564 = vmatmul.msk.f32.gmra.mxu0 %vm544_vm0, %v1561_v32 }
 0x35b   :  { %v574_v34 = vpop.f32.mrf.mxu3 }
 0x361   :  { %1565 = vmatmul.msk.f32.gmra.mxu0 %vm544_vm0, %v1562_v9 }
 0x363   :  { %v577_v35 = vpop.f32.mrf.mxu3 }
 0x3c8   :  { %v606_v36 = vpop.f32.mrf.mxu3 }
 0x3c9   :  { %v607_v10 = vadd.f32 %v606_v36, %v571_v33 }
 0x3ce   :  { %v645_v37 = vpop.f32.mrf.mxu0 }
 0x3cf   :  { %v654_v58 = vadd.f32 %v645_v37, %v607_v10 }
 0x3d0   :  { %v609_v38 = vpop.f32.mrf.mxu3 }
 0x3d1   :  { %v610_v40 = vadd.f32 %v609_v38, %v574_v34  ;;  %v2099_v45 = vadd.f32 %v659_v41, %v654_v58 }
 0x3d3   :  { %v672_v0 = vmul.f32 %v1942_v11, %v2099_v45 }
 0x3d5   :  { %v684_v53 = vmul.f32 %v672_v0, %v2099_v45 }
 0x3d6   :  { %v648_v42 = vpop.f32.mrf.mxu0 }
 0x3d7   :  { %v655_v31 = vadd.f32 %v648_v42, %v610_v40 }
 0x3d8   :  { %v612_v46 = vpop.f32.mrf.mxu3 }
 0x3d9   :  { %v2089_v44 = vadd.f32 %v663_v43, %v655_v31  ;;  %v613_v50 = vadd.f32 %v612_v46, %v577_v35 }
 0x3db   :  { %v673_v47 = vmul.f32 %v1942_v11, %v2089_v44 }
 0x3dd   :  { %677 = vadd.xlane.f32.xlu2 %v673_v47  ;;  %v685_v60 = vmul.f32 %v673_v47, %v2089_v44 }
 0x3de   :  { %v651_v5 = vpop.f32.mrf.mxu0 }
 0x3df   :  { %v656_v20 = vadd.f32 %v651_v5, %v613_v50 }
 0x3e1   :  { %v2093_v57 = vadd.f32 %v667_v54, %v656_v20 }
 0x3e3   :  { %v674_v28 = vmul.f32 %v1942_v11, %v2093_v57 }
 0x3e5   :  { %679 = vadd.xlane.f32.xlu1 %v674_v28  ;;  %689 = vadd.xlane.f32.xlu2 %v685_v60  ;;  %v686_v62 = vmul.f32 %v674_v28, %v2093_v57 }
 0x3e7   :  { %691 = vadd.xlane.f32.xlu0 %v686_v62 }
 0x3ed   :  { %675 = vadd.xlane.f32.xlu1 %v672_v0  ;;  %v1726_v0 = vmov 5  }
 0x3ee   :  { %1669 = vset.pattern.permute.xlu1 %v1726_v0 }
 0x3f5   :  { %687 = vadd.xlane.f32.xlu1 %v684_v53 }
 0x450   :  { %v678_v2 = vpop.xlane.xlu2 %677 }
 0x451   :  { %v682_v3 = vmul.f32 0.03125, %v678_v2 }
 0x453   :  { %v697_v7 = vmul.f32 %v682_v3, %v682_v3 }
 0x458   :  { %v680_v4 = vpop.xlane.xlu1 %679  ;;  %v690_v6 = vpop.xlane.xlu2 %689 }
 0x459   :  { %v683_v8 = vmul.f32 0.03125, %v680_v4  ;;  %v694_v12 = vmul.f32 0.03125, %v690_v6 }
 0x45a   :  { %v692_v13 = vpop.xlane.xlu0 %691 }
 0x45b   :  { %v698_v15 = vmul.f32 %v683_v8, %v683_v8  ;;  %v700_v61 = vsub.f32 %v694_v12, %v697_v7  ;;  %v695_v16 = vmul.f32 0.03125, %v692_v13 }
 0x45d   :  { %v703_v17 = vadd.f32 1e-05, %v700_v61  ;;  %v701_v19 = vsub.f32 %v695_v16, %v698_v15 }
 0x45f   :  { %1695 = vrsqrt.f32 %v703_v17  ;;  %v704_v23 = vadd.f32 1e-05, %v701_v19  ;;  %vm721_vm2 = vweird.f32 %v703_v17 }
 0x460   :  { %v676_v24 = vpop.xlane.xlu1 %675 }
 0x461   :  { %1697 = vrsqrt.f32 %v704_v23  ;;  %v681_v25 = vmul.f32 0.03125, %v676_v24  ;;  %vm731_vm5 = vweird.f32 %v704_v23 }
 0x463   :  { %v696_v30 = vmul.f32 %v681_v25, %v681_v25 }
 0x465   :  { %v1696_v21 = vpop.eup %1695 }
 0x466   :  { %v716_v14 = vmul.f32 %v1696_v21, %v703_v17  ;;  %vm722_vm1 = vweird.f32 %v1696_v21 }
 0x467   :  { %v1698_v18 = vpop.eup %1697  ;;  %vm723_vm4 = vmor %vm721_vm2, %vm722_vm1 }
 0x468   :  { %v717_v26 = vmul.f32 %v1696_v21, %v716_v14  ;;  %v726_v27 = vmul.f32 %v1698_v18, %v704_v23  ;;  %v688_v29 = vpop.xlane.xlu1 %687  ;;  %vm732_vm3 = vweird.f32 %v1698_v18 }
 0x469   :  { %v693_v1 = vmul.f32 0.03125, %v688_v29  ;;  %vm733_vm6 = vmor %vm731_vm5, %vm732_vm3 }
 0x46a   :  { %v718_v32 = vmul.f32 0.5, %v717_v26  ;;  %v727_v9 = vmul.f32 %v1698_v18, %v726_v27  ;;  %v1569_v26 = vld [vmem:[%s2468_s6 + $0x40] sm:$0xff]  ;;  %v1570_v27 = vld [vmem:[%s2468_s6 + $0x48] sm:$0xff] }
 0x46b   :  { %v699_v33 = vsub.f32 %v693_v1, %v696_v30  ;;  %v2145_v1 = vld [vmem:[%s2462_s2] ss:$0 sm:$0xff] }
 0x46c   :  { %v719_v34 = vsub.f32 1.5, %v718_v32  ;;  %v728_v35 = vmul.f32 0.5, %v727_v9 }
 0x46d   :  { %v702_v36 = vadd.f32 1e-05, %v699_v33 }
 0x46e   :  { %v729_v37 = vsub.f32 1.5, %v728_v35  ;;  %v720_v38 = vmul.f32 %v1696_v21, %v719_v34  ;;  %v1581_v35 = vld [vmem:[%s2468_s6 + $0x50] sm:$0xff] }
 0x46f   :  { %1699 = vrsqrt.f32 %v702_v36  ;;  %vm711_vm8 = vweird.f32 %v702_v36 }
 0x470   :  { %v724_v40 = vsel %vm723_vm4, %v1696_v21, %v720_v38  ;;  %v730_v42 = vmul.f32 %v1698_v18, %v729_v37  ;;  %v2157_v37 = vld [vmem:[%s2465_s8 + $0x20] sm:$0xff]  ;;  %v1582_v38 = vld [vmem:[%s2468_s6 + $0x58] sm:$0xff] }
 0x471   :  { %v736_v43 = vmul.f32 %v724_v40, %v1864_v39 }
 0x472   :  { %v734_v31 = vsel %vm733_vm6, %v1698_v18, %v730_v42  ;;  %v1567_v18 = vld [vmem:[%s2468_s6 + $0x30] sm:$0xff] }
 0x473   :  { %v739_v46 = vmul.f32 %v736_v43, %v682_v3  ;;  %v737_v47 = vmul.f32 %v734_v31, %v1881_v48 }
 0x475   :  { %v1700_v50 = vpop.eup %1699  ;;  %746 = vrot.lane.b32.xlu2 %v739_v46, %s1720_s18  ;;  %v740_v5 = vmul.f32 %v737_v47, %v683_v8 }
 0x476   :  { %v706_v54 = vmul.f32 %v1700_v50, %v702_v36  ;;  %vm712_vm7 = vweird.f32 %v1700_v50  ;;  %v1727_v36 = vmov 6  }
 0x477   :  { %748 = vrot.lane.b32.xlu0 %v740_v5, %s1720_s18  ;;  %vm713_vm9 = vmor %vm711_vm8, %vm712_vm7  ;;  %v814_v5 = vld [vmem:[%s2468_s6 + $0x8] sm:$0xff] }
 0x478   :  { %v707_v20 = vmul.f32 %v1700_v50, %v706_v54  ;;  %v1584_v54 = vld [vmem:[%s2468_s6 + $0x68] sm:$0xff] }
 0x47a   :  { %v708_v10 = vmul.f32 0.5, %v707_v20  ;;  %v817_v20 = vld [vmem:[%s2468_s6 + $0x20] sm:$0xff] }
 0x47c   :  { %v709_v58 = vsub.f32 1.5, %v708_v10  ;;  %v1585_v10 = vld [vmem:[%s2468_s6 + $0x70] sm:$0xff] }
 0x47d   :  { %763 = vperm.xlu2 %1667, %v736_v43  }
 0x47e   :  { %v710_v28 = vmul.f32 %v1700_v50, %v709_v58 }
 0x47f   :  { %768 = vperm.xlu0 %1666, %v737_v47   ;;  %v813_v47 = vld [vmem:[%s2468_s6] sm:$0xff] }
 0x480   :  { %v714_v60 = vsel %vm713_vm9, %v1700_v50, %v710_v28  ;;  %v816_v50 = vld [vmem:[%s2468_s6 + $0x18] sm:$0xff] }
 0x481   :  { %v735_v41 = vmul.f32 %v714_v60, %v1909_v56 }
 0x483   :  { %v738_v62 = vmul.f32 %v735_v41, %v681_v25 }
 0x485   :  { %744 = vrot.lane.b32.xlu1 %v738_v62, %s1720_s18  ;;  %758 = vperm.xlu2 %1667, %v735_v41  }
 0x487   :  { %1668 = vset.pattern.permute.xlu0 %v1726_v0 }
 0x48d   :  { %1672 = vset.pattern.permute.xlu2 %v1727_v36 }
 0x4cf   :  { %v747_v53 = vpop.permute.xlu2 %746 }
 0x4d0   :  { %v754_v2 = vsub.f32 %v1864_v39, %v747_v53 }
 0x4d2   :  { %781 = vperm.xlu0 %1668, %v754_v2  }
 0x4d7   :  { %v764_v12 = vpop.permute.xlu2 %763 }
 0x4d8   :  { %v772_v13 = vmul.f32 %v764_v12, %v2089_v44 }
 0x4da   :  { %1670 = vset.pattern.permute.xlu0 %v1727_v36 }
 0x4df   :  { %v759_v24 = vpop.permute.xlu2 %758 }
 0x4e0   :  { %v771_v44 = vmul.f32 %v759_v24, %v2099_v45  ;;  %v1568_v45 = vld [vmem:[%s2468_s6 + $0x38] sm:$0xff] }
 0x4e9   :  { %v749_v3 = vpop.permute.xlu0 %748 }
 0x4ea   :  { %v755_v4 = vsub.f32 %v1881_v48, %v749_v3 }
 0x4ec   :  { %786 = vperm.xlu1 %1669, %v755_v4  }
 0x4f1   :  { %v769_v8 = vpop.permute.xlu0 %768 }
 0x4f2   :  { %v773_v17 = vmul.f32 %v769_v8, %v2093_v57  ;;  %v1566_v57 = vld [vmem:[%s2468_s6 + $0x28] sm:$0xff] }
 0x4f7   :  { %v745_v6 = vpop.permute.xlu1 %744 }
 0x4f8   :  { %v753_v7 = vsub.f32 %v1909_v56, %v745_v6 }
 0x4fa   :  { %776 = vperm.xlu1 %1669, %v753_v7  }
 0x502   :  { %1671 = vset.pattern.permute.xlu1 %v1727_v36 }
 0x544   :  { %v782_v15 = vpop.permute.xlu0 %781 }
 0x545   :  { %v790_v61 = vadd.f32 %v782_v15, %v772_v13 }
 0x547   :  { %v793_v16 = vmax.f32 %v790_v61, 0.0 }
 0x549   :  { %806 = vrot.lane.b32.xlu1 %v793_v16, %s1719_s13 }
 0x551   :  { %797 = vrot.lane.b32.xlu1 %v793_v16, %s1720_s18 }
 0x559   :  { %990 = vperm.xlu1 %1671, %v1886_v49   ;;  %v2169_v49 = vld [vmem:[%s2463_s1] ss:$0 sm:$0xff] }
 0x55e   :  { %v787_v19 = vpop.permute.xlu1 %786 }
 0x55f   :  { %v791_v22 = vadd.f32 %v787_v19, %v773_v17 }
 0x561   :  { %v794_v23 = vmax.f32 %v791_v22, 0.0  ;;  %982 = vperm.xlu1 %1671, %v1864_v39   ;;  %v815_v39 = vld [vmem:[%s2468_s6 + $0x10] sm:$0xff] }
 0x563   :  { %799 = vrot.lane.b32.xlu0 %v794_v23, %s1720_s18  ;;  %808 = vrot.lane.b32.xlu2 %v794_v23, %s1719_s13 }
 0x564   :  { %853 = vmatpush.msrb.mxu1 %v794_v23 }
 0x566   :  { %854 = vmatpush.msrb.mxu1 %v793_v16 }
 0x56b   :  { %994 = vperm.xlu0 %1670, %v2157_v37  }
 0x56c   :  { %v777_v21 = vpop.permute.xlu1 %776 }
 0x56d   :  { %v789_v25 = vadd.f32 %v777_v21, %v771_v44 }
 0x56f   :  { %v792_v14 = vmax.f32 %v789_v25, 0.0 }
 0x571   :  { %804 = vrot.lane.b32.xlu2 %v792_v14, %s1719_s13  ;;  %855 = vmatpush.msrb.mxu1 %v792_v14 }
 0x572   :  { %1571 = vmatmul.msk.f32.vlgmr.msrb.gmra.mxu1 %vm824_vm10, %v1566_v57 }
 0x579   :  { %795 = vrot.lane.b32.xlu2 %v792_v14, %s1720_s18 }
 0x57a   :  { %1572 = vmatmul.msk.f32.gmra.mxu1 %vm824_vm10, %v1567_v18 }
 0x581   :  { %986 = vperm.xlu2 %1672, %v1881_v48  }
 0x582   :  { %1573 = vmatmul.msk.f32.gmra.mxu1 %vm824_vm10, %v1568_v45 }
 0x589   :  { %978 = vperm.xlu2 %1672, %v1909_v56   ;;  %v1583_v56 = vld [vmem:[%s2468_s6 + $0x60] sm:$0xff] }
 0x58a   :  { %1574 = vmatmul.msk.f32.gmra.mxu1 %vm824_vm10, %v1569_v26 }
 0x592   :  { %1575 = vmatmul.msk.f32.gmra.mxu1 %vm824_vm10, %v1570_v27 }
 0x5bb   :  { %v807_v29 = vpop.permute.xlu1 %806 }
 0x5bc   :  { %v811_v9 = vmul.f32 %v2145_v1, %v807_v29 }
 0x5bd   :  { %v809_v30 = vpop.permute.xlu2 %808 }
 0x5be   :  { %v812_v32 = vmul.f32 %v2145_v1, %v809_v30 }
 0x5c0   :  { %953 = vmatpush.msrb.mxu3 %v812_v32 }
 0x5c2   :  { %954 = vmatpush.msrb.mxu3 %v811_v9 }
 0x5c3   :  { %v798_v40 = vpop.permute.xlu1 %797 }
 0x5c4   :  { %v802_v48 = vmul.f32 %v2169_v49, %v798_v40 }
 0x5cb   :  { %v805_v33 = vpop.permute.xlu2 %804  ;;  %v991_v53 = vpop.permute.xlu1 %990 }
 0x5cc   :  { %v810_v34 = vmul.f32 %v2145_v1, %v805_v33 }
 0x5ce   :  { %955 = vmatpush.msrb.mxu3 %v810_v34  ;;  %v1714_v34 = vld [vmem:[%s2466_s3] ss:$0 sm:$0xff] }
 0x5cf   :  { %1586 = vmatmul.msk.f32.vlgmr.msrb.gmra.mxu3 %vm824_vm10, %v1581_v35 }
 0x5d3   :  { %v796_v31 = vpop.permute.xlu2 %795  ;;  %v983_v61 = vpop.permute.xlu1 %982 }
 0x5d4   :  { %v801_v46 = vmul.f32 %v2169_v49, %v796_v31 }
 0x5d5   :  { %v800_v42 = vpop.permute.xlu0 %799 }
 0x5d6   :  { %v803_v43 = vmul.f32 %v2169_v49, %v800_v42 }
 0x5d7   :  { %1587 = vmatmul.msk.f32.gmra.mxu3 %vm824_vm10, %v1582_v38 }
 0x5d8   :  { %900 = vmatpush.msra.mxu1 %v803_v43  ;;  %1639 = vmatpush.msrb.mxu2 %v803_v43 }
 0x5da   :  { %901 = vmatpush.msra.mxu1 %v802_v48  ;;  %1640 = vmatpush.msrb.mxu2 %v802_v48 }
 0x5db   :  { %v987_v15 = vpop.permute.xlu2 %986 }
 0x5dc   :  { %902 = vmatpush.msra.mxu1 %v801_v46  ;;  %1641 = vmatpush.msrb.mxu2 %v801_v46 }
 0x5dd   :  { %1578 = vmatmul.msk.f32.vlgmr.msrb.gmra.mxu2 %vm824_vm10, %v815_v39  ;;  %1576 = vmatmul.msk.f32.vlgmr.msra.gmra.mxu1 %vm824_vm10, %v813_v47  ;;  %v995_v27 = vpop.permute.xlu0 %994 }
 0x5df   :  { %1588 = vmatmul.msk.f32.gmra.mxu3 %vm824_vm10, %v1583_v56 }
 0x5e3   :  { %v979_v36 = vpop.permute.xlu2 %978 }
 0x5e5   :  { %1579 = vmatmul.msk.f32.gmra.mxu2 %vm824_vm10, %v816_v50  ;;  %1577 = vmatmul.msk.f32.gmra.mxu1 %vm824_vm10, %v814_v5 }
 0x5e7   :  { %1589 = vmatmul.msk.f32.gmra.mxu3 %vm824_vm10, %v1584_v54 }
 0x5ed   :  { %1580 = vmatmul.msk.f32.gmra.mxu2 %vm824_vm10, %v817_v20 }
 0x5ef   :  { %1590 = vmatmul.msk.f32.gmra.mxu3 %vm824_vm10, %v1585_v10  ;;  %v857_v58 = vpop.f32.mrf.mxu1 }
 0x5f7   :  { %v860_v28 = vpop.f32.mrf.mxu1 }
 0x5ff   :  { %v863_v60 = vpop.f32.mrf.mxu1 }
 0x607   :  { %v866_v41 = vpop.f32.mrf.mxu1 }
 0x60f   :  { %v869_v62 = vpop.f32.mrf.mxu1 }
 0x652   :  { %v957_v0 = vpop.f32.mrf.mxu3 }
 0x65a   :  { %v960_v2 = vpop.f32.mrf.mxu3  ;;  %v904_v3 = vpop.f32.mrf.mxu1 }
 0x65b   :  { %v905_v29 = vadd.f32 %v904_v3, %v857_v58 }
 0x65d   :  { %v972_v9 = vadd.f32 %v957_v0, %v905_v29 }
 0x65f   :  { %v2228_v38 = vadd.f32 %v979_v36, %v972_v9 }
 0x660   :  { %v910_v4 = vpop.f32.mrf.mxu2 }
 0x661   :  { %v911_v6 = vadd.f32 %v910_v4, %v863_v60  ;;  %v1002_v40 = vmul.f32 %v1714_v34, %v2228_v38 }
 0x662   :  { %v963_v7 = vpop.f32.mrf.mxu3  ;;  %v907_v8 = vpop.f32.mrf.mxu1 }
 0x663   :  { %v974_v12 = vadd.f32 %v963_v7, %v911_v6  ;;  %v908_v13 = vadd.f32 %v907_v8, %v860_v28  ;;  %v1022_v31 = vmul.f32 %v1002_v40, %v2228_v38 }
 0x665   :  { %v2208_v16 = vadd.f32 %v987_v15, %v974_v12  ;;  %v973_v17 = vadd.f32 %v960_v2, %v908_v13 }
 0x667   :  { %v2210_v19 = vadd.f32 %v983_v61, %v973_v17  ;;  %v1004_v22 = vmul.f32 %v1942_v11, %v2208_v16 }
 0x668   :  { %v913_v23 = vpop.f32.mrf.mxu2 }
 0x669   :  { %v914_v24 = vadd.f32 %v913_v23, %v866_v41  ;;  %1011 = vadd.xlane.f32.xlu0 %v1004_v22  ;;  %v1003_v44 = vmul.f32 %v1942_v11, %v2210_v19  ;;  %v1024_v42 = vmul.f32 %v1004_v22, %v2208_v16 }
 0x66a   :  { %v966_v21 = vpop.f32.mrf.mxu3 }
 0x66b   :  { %v975_v25 = vadd.f32 %v966_v21, %v914_v24  ;;  %1009 = vadd.xlane.f32.xlu2 %v1003_v44  ;;  %v1023_v43 = vmul.f32 %v1003_v44, %v2210_v19 }
 0x66d   :  { %v2216_v14 = vadd.f32 %v991_v53, %v975_v25  ;;  %v1728_v53 = vmov 7  }
 0x66e   :  { %1673 = vset.pattern.permute.xlu2 %v1728_v53  ;;  %1674 = vset.pattern.permute.xlu1 %v1728_v53 }
 0x66f   :  { %v1005_v57 = vmul.f32 %v1942_v11, %v2216_v14 }
 0x670   :  { %v916_v18 = vpop.f32.mrf.mxu2 }
 0x671   :  { %v917_v45 = vadd.f32 %v916_v18, %v869_v62  ;;  %1013 = vadd.xlane.f32.xlu1 %v1005_v57  ;;  %v1025_v33 = vmul.f32 %v1005_v57, %v2216_v14 }
 0x672   :  { %v969_v26 = vpop.f32.mrf.mxu3 }
 0x673   :  { %v976_v30 = vadd.f32 %v969_v26, %v917_v45 }
 0x675   :  { %v2220_v32 = vadd.f32 %v995_v27, %v976_v30 }
 0x677   :  { %v1006_v35 = vmul.f32 %v1714_v34, %v2220_v32 }
 0x679   :  { %1033 = vadd.xlane.f32.xlu1 %v1025_v33  ;;  %1015 = vadd.xlane.f32.xlu0 %v1006_v35  ;;  %v1026_v11 = vmul.f32 %v1006_v35, %v2220_v32 }
 0x67b   :  { %1035 = vadd.xlane.f32.xlu2 %v1026_v11 }
 0x681   :  { %1007 = vadd.xlane.f32.xlu1 %v1002_v40  ;;  %1031 = vadd.xlane.f32.xlu0 %v1024_v42 }
 0x683   :  { %1029 = vadd.xlane.f32.xlu2 %v1023_v43 }
 0x689   :  { %1027 = vadd.xlane.f32.xlu0 %v1022_v31 }
 0x6dc   :  { %v1012_v46 = vpop.xlane.xlu0 %1011 }
 0x6dd   :  { %v2242_v41 = vmul.f32 0.03125, %v1012_v46 }
 0x6de   :  { %v1010_v39 = vpop.xlane.xlu2 %1009 }
 0x6df   :  { %v2246_v2 = vmul.f32 0.03125, %v1010_v39  ;;  %v1044_v6 = vmul.f32 %v2242_v41, %v2242_v41  ;;  %v2259_v39 = vld [vmem:[%s2465_s8 + $0x18] sm:$0xff] }
 0x6e1   :  { %v1043_v13 = vmul.f32 %v2246_v2, %v2246_v2 }
 0x6e4   :  { %v1014_v48 = vpop.xlane.xlu1 %1013 }
 0x6e5   :  { %v2234_v47 = vmul.f32 0.03125, %v1014_v48 }
 0x6e7   :  { %v1045_v5 = vmul.f32 %v2234_v47, %v2234_v47 }
 0x6ec   :  { %v1034_v56 = vpop.xlane.xlu1 %1033  ;;  %v1016_v50 = vpop.xlane.xlu0 %1015 }
 0x6ed   :  { %v1040_v54 = vmul.f32 0.03125, %v1034_v56  ;;  %v2238_v20 = vmul.f32 0.03125, %v1016_v50 }
 0x6ee   :  { %v1036_v10 = vpop.xlane.xlu2 %1035 }
 0x6ef   :  { %v1050_v58 = vsub.f32 %v1040_v54, %v1045_v5  ;;  %v1046_v28 = vmul.f32 %v2238_v20, %v2238_v20  ;;  %v1041_v60 = vmul.f32 0.03125, %v1036_v10 }
 0x6f1   :  { %v1055_v62 = vadd.f32 1e-05, %v1050_v58  ;;  %v1051_v0 = vsub.f32 %v1041_v60, %v1046_v28 }
 0x6f3   :  { %1701 = vrsqrt.f32 %v1055_v62  ;;  %v1056_v3 = vadd.f32 1e-05, %v1051_v0  ;;  %vm1093_vm12 = vweird.f32 %v1055_v62 }
 0x6f4   :  { %v1032_v4 = vpop.xlane.xlu0 %1031  ;;  %v1008_v8 = vpop.xlane.xlu1 %1007 }
 0x6f5   :  { %1703 = vrsqrt.f32 %v1056_v3  ;;  %v1039_v7 = vmul.f32 0.03125, %v1032_v4  ;;  %v2252_v22 = vmul.f32 0.03125, %v1008_v8  ;;  %vm1103_vm15 = vweird.f32 %v1056_v3 }
 0x6f6   :  { %v1030_v12 = vpop.xlane.xlu2 %1029 }
 0x6f7   :  { %v1049_v15 = vsub.f32 %v1039_v7, %v1044_v6  ;;  %v1038_v61 = vmul.f32 0.03125, %v1030_v12  ;;  %v1042_v26 = vmul.f32 %v2252_v22, %v2252_v22 }
 0x6f9   :  { %v1702_v17 = vpop.eup %1701  ;;  %v1054_v23 = vadd.f32 1e-05, %v1049_v15  ;;  %v1048_v24 = vsub.f32 %v1038_v61, %v1043_v13  ;;  %v2270_v15 = vld [vmem:[%s2465_s8 + $0x10] sm:$0xff] }
 0x6fa   :  { %v1088_v44 = vmul.f32 %v1702_v17, %v1055_v62  ;;  %vm1094_vm11 = vweird.f32 %v1702_v17 }
 0x6fb   :  { %v1704_v21 = vpop.eup %1703  ;;  %1705 = vrsqrt.f32 %v1054_v23  ;;  %v1053_v25 = vadd.f32 1e-05, %v1048_v24  ;;  %vm1095_vm13 = vmor %vm1093_vm12, %vm1094_vm11  ;;  %vm1083_vm4 = vweird.f32 %v1054_v23 }
 0x6fc   :  { %v1089_v57 = vmul.f32 %v1702_v17, %v1088_v44  ;;  %v1098_v18 = vmul.f32 %v1704_v21, %v1056_v3  ;;  %v1028_v45 = vpop.xlane.xlu0 %1027  ;;  %vm1104_vm14 = vweird.f32 %v1704_v21 }
 0x6fd   :  { %1707 = vrsqrt.f32 %v1053_v25  ;;  %v1037_v27 = vmul.f32 0.03125, %v1028_v45  ;;  %vm1105_vm1 = vmor %vm1103_vm15, %vm1104_vm14  ;;  %vm1073_vm6 = vweird.f32 %v1053_v25 }
 0x6fe   :  { %v1090_v29 = vmul.f32 0.5, %v1089_v57  ;;  %v1099_v30 = vmul.f32 %v1704_v21, %v1098_v18  ;;  %v2286_v18 = vld [vmem:[%s2465_s8] sm:$0xff] }
 0x6ff   :  { %v1047_v9 = vsub.f32 %v1037_v27, %v1042_v26 }
 0x700   :  { %v1091_v33 = vsub.f32 1.5, %v1090_v29  ;;  %v1100_v34 = vmul.f32 0.5, %v1099_v30 }
 0x701   :  { %v1706_v35 = vpop.eup %1705  ;;  %v1052_v36 = vadd.f32 1e-05, %v1047_v9 }
 0x702   :  { %v1101_v11 = vsub.f32 1.5, %v1100_v34  ;;  %v1078_v40 = vmul.f32 %v1706_v35, %v1054_v23  ;;  %v1092_v42 = vmul.f32 %v1702_v17, %v1091_v33  ;;  %vm1084_vm2 = vweird.f32 %v1706_v35 }
 0x703   :  { %v1708_v43 = vpop.eup %1707  ;;  %1709 = vrsqrt.f32 %v1052_v36  ;;  %vm1085_vm5 = vmor %vm1083_vm4, %vm1084_vm2  ;;  %vm1063_vm9 = vweird.f32 %v1052_v36 }
 0x704   :  { %v1079_v31 = vmul.f32 %v1706_v35, %v1078_v40  ;;  %v1068_v48 = vmul.f32 %v1708_v43, %v1053_v25  ;;  %v1096_v46 = vsel %vm1095_vm13, %v1702_v17, %v1092_v42  ;;  %v1102_v50 = vmul.f32 %v1704_v21, %v1101_v11 }
 0x705   :  { %v1110_v56 = vmul.f32 %v2259_v39, %v1096_v46  ;;  %vm1074_vm3 = vweird.f32 %v1708_v43 }
 0x706   :  { %v1080_v5 = vmul.f32 0.5, %v1079_v31  ;;  %v1069_v54 = vmul.f32 %v1708_v43, %v1068_v48  ;;  %v1106_v58 = vsel %vm1105_vm1, %v1704_v21, %v1102_v50  ;;  %vm1075_vm7 = vmor %vm1073_vm6, %vm1074_vm3 }
 0x707   :  { %v1115_v10 = vmul.f32 %v1110_v56, %v2234_v47  ;;  %v1111_v62 = vmul.f32 %v2157_v37, %v1106_v58 }
 0x708   :  { %v1081_v28 = vsub.f32 1.5, %v1080_v5  ;;  %v1070_v60 = vmul.f32 0.5, %v1069_v54 }
 0x709   :  { %v1710_v0 = vpop.eup %1709  ;;  %1128 = vrot.lane.b32.xlu2 %v1115_v10, %s1720_s18  ;;  %v1116_v6 = vmul.f32 %v1111_v62, %v2238_v20  ;;  %v2276_v20 = vld [vmem:[%s2465_s8 + $0x8] sm:$0xff] }
 0x70a   :  { %v1071_v3 = vsub.f32 1.5, %v1070_v60  ;;  %v1058_v4 = vmul.f32 %v1710_v0, %v1052_v36  ;;  %v1082_v7 = vmul.f32 %v1706_v35, %v1081_v28  ;;  %vm1064_vm8 = vweird.f32 %v1710_v0 }
 0x70b   :  { %1130 = vrot.lane.b32.xlu1 %v1116_v6, %s1720_s18  ;;  %vm1065_vm10 = vmor %vm1063_vm9, %vm1064_vm8 }
 0x70c   :  { %v1059_v8 = vmul.f32 %v1710_v0, %v1058_v4  ;;  %v1072_v47 = vmul.f32 %v1708_v43, %v1071_v3  ;;  %v1086_v12 = vsel %vm1085_vm5, %v1706_v35, %v1082_v7 }
 0x70d   :  { %v1109_v61 = vmul.f32 %v2270_v15, %v1086_v12 }
 0x70e   :  { %v1060_v13 = vmul.f32 0.5, %v1059_v8  ;;  %v1076_v17 = vsel %vm1075_vm7, %v1708_v43, %v1072_v47 }
 0x70f   :  { %v1108_v23 = vmul.f32 %v2276_v20, %v1076_v17  ;;  %v1114_v44 = vmul.f32 %v1109_v61, %v2242_v41  ;;  %v1592_v17 = vld [vmem:[%s2469_s7 + $0x48] sm:$0xff] }
 0x710   :  { %v1061_v24 = vsub.f32 1.5, %v1060_v13 }
 0x711   :  { %1164 = vperm.xlu2 %1673, %v1111_v62   ;;  %v1113_v21 = vmul.f32 %v1108_v23, %v2246_v2  ;;  %1126 = vrot.lane.b32.xlu0 %v1114_v44, %s1720_s18  ;;  %v1729_v2 = vmov 8  }
 0x712   :  { %v1062_v25 = vmul.f32 %v1710_v0, %v1061_v24  ;;  %1676 = vset.pattern.permute.xlu0 %v1729_v2 }
 0x713   :  { %1124 = vrot.lane.b32.xlu1 %v1113_v21, %s1720_s18 }
 0x714   :  { %v1066_v57 = vsel %vm1065_vm10, %v1710_v0, %v1062_v25  ;;  %v1593_v25 = vld [vmem:[%s2469_s7 + $0x50] sm:$0xff] }
 0x715   :  { %v1107_v45 = vmul.f32 %v2286_v18, %v1066_v57 }
 0x717   :  { %v1112_v41 = vmul.f32 %v1107_v45, %v2252_v22 }
 0x719   :  { %1154 = vperm.xlu2 %1673, %v1109_v61   ;;  %1122 = vrot.lane.b32.xlu0 %v1112_v41, %s1720_s18 }
 0x71b   :  { %1159 = vperm.xlu1 %1674, %v1110_v56  }
 0x721   :  { %1149 = vperm.xlu2 %1673, %v1108_v23  }
 0x723   :  { %1675 = vset.pattern.permute.xlu1 %v1729_v2 }
 0x729   :  { %1678 = vset.pattern.permute.xlu2 %v1729_v2 }
 0x763   :  { %v1129_v22 = vpop.permute.xlu2 %1128 }
 0x764   :  { %v1140_v34 = vsub.f32 %v2259_v39, %v1129_v22  ;;  %v1615_v22 = vld [vmem:[%s2469_s7 + $0x80] sm:$0xff] }
 0x76b   :  { %v1165_v11 = vpop.permute.xlu2 %1164 }
 0x76c   :  { %v1171_v50 = vmul.f32 %v1165_v11, %v2220_v32  ;;  %v1245_v11 = vld [vmem:[%s2469_s7 + $0x18] sm:$0xff] }
 0x773   :  { %v1155_v40 = vpop.permute.xlu2 %1154 }
 0x774   :  { %v1169_v58 = vmul.f32 %v1155_v40, %v2208_v16  ;;  %v1618_v40 = vld [vmem:[%s2469_s7 + $0x98] sm:$0xff] }
 0x77b   :  { %v1150_v42 = vpop.permute.xlu2 %1149 }
 0x77c   :  { %v1168_v43 = vmul.f32 %v1150_v42, %v2210_v19  ;;  %v1598_v42 = vld [vmem:[%s2469_s7 + $0x78] sm:$0xff] }
 0x77d   :  { %v1131_v26 = vpop.permute.xlu1 %1130 }
 0x77e   :  { %v1141_v27 = vsub.f32 %v2157_v37, %v1131_v26 }
 0x780   :  { %1194 = vperm.xlu0 %1676, %v1141_v27  }
 0x783   :  { %v1127_v29 = vpop.permute.xlu0 %1126 }
 0x784   :  { %v1139_v30 = vsub.f32 %v2270_v15, %v1127_v29 }
 0x785   :  { %v1125_v9 = vpop.permute.xlu1 %1124 }
 0x786   :  { %v1138_v33 = vsub.f32 %v2276_v20, %v1125_v9  ;;  %1184 = vperm.xlu1 %1675, %v1139_v30   ;;  %v1594_v30 = vld [vmem:[%s2469_s7 + $0x58] sm:$0xff] }
 0x788   :  { %1179 = vperm.xlu2 %1678, %v1138_v33   ;;  %1677 = vset.pattern.permute.xlu0 %v1728_v53 }
 0x789   :  { %1144 = vperm.xlu0 %1677, %v1107_v45   ;;  %v1730_v45 = vmov 9  }
 0x78b   :  { %v1123_v35 = vpop.permute.xlu0 %1122 }
 0x78c   :  { %v1137_v36 = vsub.f32 %v2286_v18, %v1123_v35  ;;  %v1617_v35 = vld [vmem:[%s2469_s7 + $0x90] sm:$0xff] }
 0x78d   :  { %v1160_v53 = vpop.permute.xlu1 %1159 }
 0x78e   :  { %1189 = vperm.xlu1 %1675, %v1140_v34   ;;  %v1170_v0 = vmul.f32 %v1160_v53, %v2216_v14  ;;  %v1244_v34 = vld [vmem:[%s2469_s7 + $0x10] sm:$0xff]  ;;  %v1247_v53 = vld [vmem:[%s2469_s7 + $0x28] sm:$0xff] }
 0x790   :  { %1681 = vset.pattern.permute.xlu2 %v1730_v45 }
 0x791   :  { %1680 = vset.pattern.permute.xlu0 %v1730_v45 }
 0x796   :  { %1174 = vperm.xlu1 %1675, %v1137_v36   ;;  %v1597_v36 = vld [vmem:[%s2469_s7 + $0x70] sm:$0xff] }
 0x79e   :  { %1679 = vset.pattern.permute.xlu1 %v1730_v45 }
 0x7e2   :  { %v1180_v31 = vpop.permute.xlu2 %1179 }
 0x7e3   :  { %v1198_v48 = vadd.f32 %v1180_v31, %v1168_v43  ;;  %v40_v43 = vld [vmem:[%s2465_s8 + $0x28] sm:$0xff]  ;;  %v41_v31 = vld [vmem:[%s2465_s8 + $0x30] sm:$0xff] }
 0x7e5   :  { %v1203_v46 = vmax.f32 %v1198_v48, 0.0  ;;  %v42_v48 = vld [vmem:[%s2465_s8 + $0x38] sm:$0xff] }
 0x7e7   :  { %v1208_v56 = vadd.f32 %v1203_v46, %v2004_v52  ;;  %v1246_v46 = vld [vmem:[%s2469_s7 + $0x20] sm:$0xff] }
 0x7e9   :  { %1229 = vrot.lane.b32.xlu0 %v1208_v56, %s1719_s13 }
 0x7f2   :  { %v1195_v5 = vpop.permute.xlu0 %1194 }
 0x7f3   :  { %v1201_v54 = vadd.f32 %v1195_v5, %v1171_v50  ;;  %v1620_v50 = vld [vmem:[%s2469_s7 + $0xa8] sm:$0xff]  ;;  %v1248_v5 = vld [vmem:[%s2469_s7 + $0x30] sm:$0xff] }
 0x7f5   :  { %v1206_v10 = vmax.f32 %v1201_v54, 0.0  ;;  %v1621_v54 = vld [vmem:[%s2469_s7 + $0xb0] sm:$0xff] }
 0x7f7   :  { %v1211_v28 = vadd.f32 %v1206_v10, %v2016_v59  ;;  %v1249_v10 = vld [vmem:[%s2469_s7 + $0x38] sm:$0xff] }
 0x7f8   :  { %v1185_v60 = vpop.permute.xlu1 %1184 }
 0x7f9   :  { %v1199_v62 = vadd.f32 %v1185_v60, %v1169_v58  ;;  %1220 = vrot.lane.b32.xlu0 %v1211_v28, %s1720_s18  ;;  %1294 = vmatpush.msra.mxu0 %v1211_v28  ;;  %v1622_v58 = vld [vmem:[%s2469_s7 + $0xb8] sm:$0xff] }
 0x7fb   :  { %v1204_v19 = vmax.f32 %v1199_v62, 0.0  ;;  %v1145_v16 = vpop.permute.xlu0 %1144 }
 0x7fc   :  { %v1167_v6 = vmul.f32 %v1145_v16, %v2228_v38 }
 0x7fd   :  { %v1209_v52 = vadd.f32 %v1204_v19, %v2002_v51 }
 0x7ff   :  { %1231 = vrot.lane.b32.xlu2 %v1209_v52, %s1719_s13 }
 0x800   :  { %v1190_v32 = vpop.permute.xlu1 %1189 }
 0x801   :  { %v1200_v3 = vadd.f32 %v1190_v32, %v1170_v0  ;;  %1214 = vrot.lane.b32.xlu0 %v1208_v56, %s1720_s18 }
 0x803   :  { %v1205_v4 = vmax.f32 %v1200_v3, 0.0 }
 0x805   :  { %v1210_v59 = vadd.f32 %v1205_v4, %v2011_v55 }
 0x807   :  { %1233 = vrot.lane.b32.xlu1 %v1210_v59, %s1719_s13  ;;  %1235 = vrot.lane.b32.xlu2 %v1211_v28, %s1719_s13 }
 0x808   :  { %1295 = vmatpush.msra.mxu0 %v1210_v59  ;;  %v1175_v51 = vpop.permute.xlu1 %1174 }
 0x809   :  { %v1197_v7 = vadd.f32 %v1175_v51, %v1167_v6  ;;  %1476 = vperm.xlu0 %1680, %v2276_v20  }
 0x80a   :  { %1296 = vmatpush.msra.mxu0 %v1209_v52 }
 0x80b   :  { %v1202_v14 = vmax.f32 %v1197_v7, 0.0 }
 0x80c   :  { %1297 = vmatpush.msra.mxu0 %v1208_v56  ;;  %v1619_v56 = vld [vmem:[%s2469_s7 + $0xa0] sm:$0xff] }
 0x80d   :  { %v1207_v8 = vadd.f32 %v1202_v14, %v2031_v63  ;;  %v1591_v63 = vld [vmem:[%s2469_s7 + $0x40] sm:$0xff] }
 0x80f   :  { %1218 = vrot.lane.b32.xlu1 %v1210_v59, %s1720_s18  ;;  %1216 = vrot.lane.b32.xlu2 %v1209_v52, %s1720_s18 }
 0x810   :  { %1298 = vmatpush.msra.mxu0 %v1207_v8 }
 0x811   :  { %1599 = vmatmul.msk.f32.vlgmr.msra.gmra.mxu0 %vm544_vm0, %v1591_v63  ;;  %1498 = vperm.xlu0 %1680, %v41_v31  }
 0x817   :  { %1212 = vrot.lane.b32.xlu2 %v1207_v8, %s1720_s18  ;;  %1227 = vrot.lane.b32.xlu1 %v1207_v8, %s1719_s13 }
 0x819   :  { %1600 = vmatmul.msk.f32.gmra.mxu0 %vm544_vm0, %v1592_v17 }
 0x81f   :  { %1472 = vperm.xlu1 %1679, %v2286_v18   ;;  %1480 = vperm.xlu2 %1681, %v2270_v15   ;;  %v1242_v15 = vld [vmem:[%s2469_s7] sm:$0xff] }
 0x821   :  { %1601 = vmatmul.msk.f32.gmra.mxu0 %vm544_vm0, %v1593_v25 }
 0x827   :  { %1484 = vperm.xlu1 %1679, %v2259_v39   ;;  %1488 = vperm.xlu2 %1681, %v2157_v37   ;;  %v1616_v39 = vld [vmem:[%s2469_s7 + $0x88] sm:$0xff] }
 0x828   :  { %v1596_v37 = vld [vmem:[%s2469_s7 + $0x68] sm:$0xff] }
 0x829   :  { %1602 = vmatmul.msk.f32.gmra.mxu0 %vm544_vm0, %v1594_v30 }
 0x82f   :  { %1493 = vperm.xlu1 %1679, %v40_v43   ;;  %1503 = vperm.xlu2 %1681, %v42_v48  }
 0x859   :  { %v1232_v55 = vpop.permute.xlu2 %1231 }
 0x85a   :  { %v1239_v21 = vmul.f32 %v2145_v1, %v1232_v55 }
 0x85b   :  { %v1230_v12 = vpop.permute.xlu0 %1229 }
 0x85c   :  { %v1238_v57 = vmul.f32 %v2145_v1, %v1230_v12 }
 0x861   :  { %v1236_v38 = vpop.permute.xlu2 %1235 }
 0x862   :  { %v1241_v47 = vmul.f32 %v2145_v1, %v1236_v38 }
 0x864   :  { %1433 = vmatpush.msra.mxu2 %v1241_v47 }
 0x869   :  { %v1217_v44 = vpop.permute.xlu2 %1216 }
 0x86a   :  { %v1224_v27 = vmul.f32 %v2169_v49, %v1217_v44 }
 0x86b   :  { %v1221_v13 = vpop.permute.xlu0 %1220 }
 0x86c   :  { %v1226_v61 = vmul.f32 %v2169_v49, %v1221_v13 }
 0x86e   :  { %1359 = vmatpush.msrb.mxu1 %v1226_v61 }
 0x871   :  { %v1213_v29 = vpop.permute.xlu2 %1212 }
 0x872   :  { %v1222_v18 = vmul.f32 %v2169_v49, %v1213_v29 }
 0x873   :  { %v1215_v26 = vpop.permute.xlu0 %1214 }
 0x874   :  { %v1223_v9 = vmul.f32 %v2169_v49, %v1215_v26 }
 0x879   :  { %v1234_v23 = vpop.permute.xlu1 %1233  ;;  %v1481_v47 = vpop.permute.xlu2 %1480 }
 0x87a   :  { %v1240_v24 = vmul.f32 %v2145_v1, %v1234_v23 }
 0x87b   :  { %v1477_v6 = vpop.permute.xlu0 %1476 }
 0x87c   :  { %1434 = vmatpush.msra.mxu2 %v1240_v24 }
 0x87e   :  { %1435 = vmatpush.msra.mxu2 %v1239_v21 }
 0x880   :  { %1436 = vmatpush.msra.mxu2 %v1238_v57 }
 0x881   :  { %v1219_v41 = vpop.permute.xlu1 %1218 }
 0x882   :  { %v1225_v2 = vmul.f32 %v2169_v49, %v1219_v41  ;;  %v1595_v49 = vld [vmem:[%s2469_s7 + $0x60] sm:$0xff] }
 0x883   :  { %1603 = vmatmul.msk.f32.gmra.mxu0 %vm544_vm0, %v1595_v49 }
 0x884   :  { %1360 = vmatpush.msrb.mxu1 %v1225_v2  ;;  %v1489_v2 = vpop.permute.xlu2 %1488 }
 0x886   :  { %1361 = vmatpush.msrb.mxu1 %v1224_v27 }
 0x888   :  { %1362 = vmatpush.msrb.mxu1 %v1223_v9 }
 0x889   :  { %v1228_v20 = vpop.permute.xlu1 %1227 }
 0x88a   :  { %v1237_v33 = vmul.f32 %v2145_v1, %v1228_v20  ;;  %1363 = vmatpush.msrb.mxu1 %v1222_v18  ;;  %v1243_v1 = vld [vmem:[%s2469_s7 + $0x8] sm:$0xff] }
 0x88b   :  { %1607 = vmatmul.msk.f32.vlgmr.msrb.gmra.mxu1 %vm544_vm0, %v1242_v15  ;;  %1604 = vmatmul.msk.f32.gmra.mxu0 %vm544_vm0, %v1596_v37  ;;  %v1499_v37 = vpop.permute.xlu0 %1498 }
 0x88c   :  { %1437 = vmatpush.msra.mxu2 %v1237_v33  ;;  %v1504_v31 = vpop.permute.xlu2 %1503 }
 0x88d   :  { %1623 = vmatmul.msk.f32.vlgmr.msra.gmra.mxu2 %vm544_vm0, %v1615_v22 }
 0x88e   :  { %v1300_v28 = vpop.f32.mrf.mxu0 }
 0x891   :  { %v1473_v0 = vpop.permute.xlu1 %1472 }
 0x893   :  { %1608 = vmatmul.msk.f32.gmra.mxu1 %vm544_vm0, %v1243_v1  ;;  %1605 = vmatmul.msk.f32.gmra.mxu0 %vm544_vm0, %v1597_v36 }
 0x895   :  { %1624 = vmatmul.msk.f32.gmra.mxu2 %vm544_vm0, %v1616_v39 }
 0x896   :  { %v1303_v60 = vpop.f32.mrf.mxu0 }
 0x899   :  { %v1485_v24 = vpop.permute.xlu1 %1484 }
 0x89b   :  { %1609 = vmatmul.msk.f32.gmra.mxu1 %vm544_vm0, %v1244_v34  ;;  %1606 = vmatmul.msk.f32.gmra.mxu0 %vm544_vm0, %v1598_v42 }
 0x89d   :  { %1625 = vmatmul.msk.f32.gmra.mxu2 %vm544_vm0, %v1617_v35 }
 0x89e   :  { %v1306_v52 = vpop.f32.mrf.mxu0 }
 0x8a1   :  { %v1494_v15 = vpop.permute.xlu1 %1493 }
 0x8a3   :  { %1610 = vmatmul.msk.f32.gmra.mxu1 %vm544_vm0, %v1245_v11 }
 0x8a5   :  { %1626 = vmatmul.msk.f32.gmra.mxu2 %vm544_vm0, %v1618_v40 }
 0x8a6   :  { %v1309_v8 = vpop.f32.mrf.mxu0 }
 0x8ab   :  { %1611 = vmatmul.msk.f32.gmra.mxu1 %vm544_vm0, %v1246_v46 }
 0x8ad   :  { %1627 = vmatmul.msk.f32.gmra.mxu2 %vm544_vm0, %v1619_v56 }
 0x8b3   :  { %1612 = vmatmul.msk.f32.gmra.mxu1 %vm544_vm0, %v1247_v53 }
 0x8b5   :  { %1628 = vmatmul.msk.f32.gmra.mxu2 %vm544_vm0, %v1620_v50 }
 0x8bb   :  { %1613 = vmatmul.msk.f32.gmra.mxu1 %vm544_vm0, %v1248_v5 }
 0x8bd   :  { %1629 = vmatmul.msk.f32.gmra.mxu2 %vm544_vm0, %v1621_v54 }
 0x8c3   :  { %1614 = vmatmul.msk.f32.gmra.mxu1 %vm544_vm0, %v1249_v10 }
 0x8c5   :  { %1630 = vmatmul.msk.f32.gmra.mxu2 %vm544_vm0, %v1622_v58 }
 0x900   :  { %v1312_v63 = vpop.f32.mrf.mxu0 }
 0x908   :  { %v1365_v62 = vpop.f32.mrf.mxu1  ;;  %v1315_v41 = vpop.f32.mrf.mxu0 }
 0x909   :  { %v1366_v19 = vadd.f32 %v1365_v62, %v1300_v28 }
 0x910   :  { %v1439_v32 = vpop.f32.mrf.mxu2  ;;  %v1368_v3 = vpop.f32.mrf.mxu1 }
 0x911   :  { %v1463_v4 = vadd.f32 %v1439_v32, %v1366_v19  ;;  %v1369_v59 = vadd.f32 %v1368_v3, %v1303_v60  ;;  %v1318_v18 = vpop.f32.mrf.mxu0 }
 0x913   :  { %v1506_v16 = vadd.f32 %v1473_v0, %v1463_v4 }
 0x915   :  { %1514 = vst [vmem:[%s2470_s9] sm:$0xff] %v1506_v16 }
 0x918   :  { %v1442_v51 = vpop.f32.mrf.mxu2  ;;  %v1371_v7 = vpop.f32.mrf.mxu1 }
 0x919   :  { %v1464_v14 = vadd.f32 %v1442_v51, %v1369_v59  ;;  %v1372_v38 = vadd.f32 %v1371_v7, %v1306_v52  ;;  %v1321_v35 = vpop.f32.mrf.mxu0 }
 0x91b   :  { %v1507_v55 = vadd.f32 %v1477_v6, %v1464_v14 }
 0x91d   :  { %1515 = vst [vmem:[%s2470_s9 + $0x8] sm:$0xff] %v1507_v55 }
 0x920   :  { %v1445_v12 = vpop.f32.mrf.mxu2  ;;  %v1374_v13 = vpop.f32.mrf.mxu1 }
 0x921   :  { %v1465_v61 = vadd.f32 %v1445_v12, %v1372_v38  ;;  %v1375_v23 = vadd.f32 %v1374_v13, %v1309_v8 }
 0x923   :  { %v1508_v17 = vadd.f32 %v1481_v47, %v1465_v61 }
 0x925   :  { %1516 = vst [vmem:[%s2470_s9 + $0x10] sm:$0xff] %v1508_v17 }
 0x928   :  { %v1448_v44 = vpop.f32.mrf.mxu2  ;;  %v1377_v21 = vpop.f32.mrf.mxu1 }
 0x929   :  { %v1466_v25 = vadd.f32 %v1448_v44, %v1375_v23  ;;  %v1378_v45 = vadd.f32 %v1377_v21, %v1312_v63 }
 0x92b   :  { %v1509_v57 = vadd.f32 %v1485_v24, %v1466_v25 }
 0x92d   :  { %1517 = vst [vmem:[%s2470_s9 + $0x18] sm:$0xff] %v1509_v57 }
 0x930   :  { %v1451_v26 = vpop.f32.mrf.mxu2  ;;  %v1380_v27 = vpop.f32.mrf.mxu1 }
 0x931   :  { %v1467_v29 = vadd.f32 %v1451_v26, %v1378_v45  ;;  %v1381_v9 = vadd.f32 %v1380_v27, %v1315_v41 }
 0x933   :  { %v1510_v30 = vadd.f32 %v1489_v2, %v1467_v29 }
 0x935   :  { %1518 = vst [vmem:[%s2470_s9 + $0x20] sm:$0xff] %v1510_v30 }
 0x938   :  { %v1454_v20 = vpop.f32.mrf.mxu2  ;;  %v1383_v33 = vpop.f32.mrf.mxu1 }
 0x939   :  { %v1468_v22 = vadd.f32 %v1454_v20, %v1381_v9  ;;  %v1384_v1 = vadd.f32 %v1383_v33, %v1318_v18 }
 0x93b   :  { %v1511_v49 = vadd.f32 %v1494_v15, %v1468_v22 }
 0x93d   :  { %1519 = vst [vmem:[%s2470_s9 + $0x28] sm:$0xff] %v1511_v49 }
 0x940   :  { %v1457_v39 = vpop.f32.mrf.mxu2  ;;  %v1386_v36 = vpop.f32.mrf.mxu1 }
 0x941   :  { %v1469_v34 = vadd.f32 %v1457_v39, %v1384_v1  ;;  %v1387_v40 = vadd.f32 %v1386_v36, %v1321_v35 }
 0x943   :  { %v1512_v11 = vadd.f32 %v1499_v37, %v1469_v34 }
 0x945   :  { %1520 = vst [vmem:[%s2470_s9 + $0x30] sm:$0xff] %v1512_v11 }
 0x948   :  { %v1460_v42 = vpop.f32.mrf.mxu2 }
 0x949   :  { %v1470_v43 = vadd.f32 %v1460_v42, %v1387_v40 }
 0x94b   :  { %v1513_v48 = vadd.f32 %v1504_v31, %v1470_v43 }
 0x94d   :  { %1521 = vst [vmem:[%s2470_s9 + $0x38] sm:$0xff] %v1513_v48 }

</bundles_post_ra>
